<compile_context>
chip_gen: v7x
topology: tpu7x:2x2x1
jax: 0.10.0
libtpu: 0.0.40
codegen_flags: <defaults>
</compile_context>

<pallas_src>
import math
from functools import partial

import jax
import jax.numpy as jnp
import numpy as np
from jax import lax
from jax.experimental import pallas as pl
from jax.experimental.pallas import tpu as pltpu


# ----------------------------- Pallas kernel ------------------------------ #

def _transformer_block_kernel(x_ref, pe_ref, mask_ref,
                              wqkv_ref, bqkv_ref, wo_ref, bo_ref,
                              g1_ref, b1_ref, w1_ref, bf1_ref, w2_ref, bf2_ref,
                              g2_ref, b2_ref, o_ref, *, num_heads):
    R = x_ref.shape[1]                      # stacked rows = S * C
    E = x_ref.shape[2]
    Dh = E // num_heads
    scale = 1.0 / math.sqrt(Dh)

    # --- positional encoding (pe row r = pe[city(r)]) ---
    x = x_ref[0] + pe_ref[...]                                      # (R, E) f32

    # --- fused QKV projection, one stacked matmul on the MXU (bf16 in, f32 acc) ---
    xb = x.astype(jnp.bfloat16)
    qkv = jnp.dot(xb, wqkv_ref[...],
                  preferred_element_type=jnp.float32) + bqkv_ref[...]   # (R, 3E) f32

    # --- additive block-diag(city) + causal mask, precomputed in the wrapper ---
    neg_mask = mask_ref[...]                                        # (R, R) f32 {0, -1e30}

    dn = (((1,), (1,)), ((), ()))   # contract last dims of both operands (q @ k^T)

    head_ctx = []
    for h in range(num_heads):      # num_heads is small/static (2); everything inside is batched over R
        qh = (qkv[:, h * Dh:(h + 1) * Dh] * scale).astype(jnp.bfloat16)
        kh = qkv[:, E + h * Dh:E + (h + 1) * Dh].astype(jnp.bfloat16)
        vh = qkv[:, 2 * E + h * Dh:2 * E + (h + 1) * Dh].astype(jnp.bfloat16)

        s = lax.dot_general(qh, kh, dn, preferred_element_type=jnp.float32)   # (R, R) f32
        s = s + neg_mask
        m = jnp.max(s, axis=-1, keepdims=True)
        p = jnp.exp(s - m)                                          # masked entries -> 0
        denom = jnp.sum(p, axis=-1, keepdims=True)
        p = p * pl.reciprocal(denom, approx=True)                   # EUP reciprocal
        head_ctx.append(jnp.dot(p.astype(jnp.bfloat16), vh,
                                preferred_element_type=jnp.float32))          # (R, Dh) f32
    ctx = jnp.concatenate(head_ctx, axis=-1)                        # (R, E) f32

    # --- output projection ---
    attn_out = jnp.dot(ctx.astype(jnp.bfloat16), wo_ref[...],
                       preferred_element_type=jnp.float32) + bo_ref[...]

    # --- residual + LayerNorm1 (f32) ---
    x1 = x + attn_out
    mu1 = jnp.mean(x1, axis=-1, keepdims=True)
    var1 = jnp.mean((x1 - mu1) ** 2, axis=-1, keepdims=True)
    y = (x1 - mu1) * lax.rsqrt(var1 + 1e-5) * g1_ref[...] + b1_ref[...]

    # --- feed-forward (stacked matmuls, bf16 in / f32 acc) ---
    hdn = jnp.maximum(
        jnp.dot(y.astype(jnp.bfloat16), w1_ref[...],
                preferred_element_type=jnp.float32) + bf1_ref[...], 0.0)
    ff = jnp.dot(hdn.astype(jnp.bfloat16), w2_ref[...],
                 preferred_element_type=jnp.float32) + bf2_ref[...]

    # --- residual + LayerNorm2 (f32) ---
    x2 = y + ff
    mu2 = jnp.mean(x2, axis=-1, keepdims=True)
    var2 = jnp.mean((x2 - mu2) ** 2, axis=-1, keepdims=True)
    out = (x2 - mu2) * lax.rsqrt(var2 + 1e-5) * g2_ref[...] + b2_ref[...]

    o_ref[0] = out.astype(o_ref.dtype)


# ------------------------------ JAX wrapper -------------------------------- #

def transformer_with_pe_forward(x, params, *, num_heads):
    """x: (B, S, C, E) float32 (same axis convention as the PyTorch forward)."""
    B, S, C, E = x.shape
    assert E % num_heads == 0
    H = params["w1"].shape[0]                 # hidden_dim
    R = S * C                                 # stacked rows per batch (row = s*C + c)

    # Free, layout-preserving regroup (no HBM transpose): (B,S,C,E) -> (B, S*C, E).
    x_r = x.reshape(B, R, E)

    # PE per stacked row: pe_rows[s*C + c] = pe[c]  (PE is city-indexed in this model).
    pe_rows = jnp.tile(params["pe"][:C], (S, 1)).astype(jnp.float32)          # (R, E)

    # Additive attention mask over the stacked rows: allow same city & causal in s.
    s_idx = jnp.arange(R, dtype=jnp.int32) // C
    c_idx = jnp.arange(R, dtype=jnp.int32) % C
    allowed = (c_idx[:, None] == c_idx[None, :]) & (s_idx[None, :] <= s_idx[:, None])
    neg_mask = jnp.where(allowed, 0.0, -1e30).astype(jnp.float32)             # (R, R)

    bf16 = jnp.bfloat16
    wqkv_t = params["in_proj_weight"].T.astype(bf16)      # (E, 3E)
    bqkv = params["in_proj_bias"].reshape(1, 3 * E)
    wo_t = params["out_proj_weight"].T.astype(bf16)       # (E, E)
    bo = params["out_proj_bias"].reshape(1, E)
    g1 = params["ln1_gamma"].reshape(1, E)
    b1 = params["ln1_beta"].reshape(1, E)
    w1_t = params["w1"].T.astype(bf16)                    # (E, H)
    bf1 = params["b1"].reshape(1, H)
    w2_t = params["w2"].T.astype(bf16)                    # (H, E)
    bf2 = params["b2"].reshape(1, E)
    g2 = params["ln2_gamma"].reshape(1, E)
    b2 = params["ln2_beta"].reshape(1, E)

    def full(shape):
        return pl.BlockSpec(shape, lambda b: (0, 0))

    out_r = pl.pallas_call(
        partial(_transformer_block_kernel, num_heads=num_heads),
        out_shape=jax.ShapeDtypeStruct((B, R, E), x.dtype),
        grid=(B,),
        in_specs=[
            pl.BlockSpec((1, R, E), lambda b: (b, 0, 0)),   # x rows for this batch
            full((R, E)),                                   # PE rows
            full((R, R)),                                   # additive attn mask
            full((E, 3 * E)), full((1, 3 * E)),             # qkv proj
            full((E, E)), full((1, E)),                     # out proj
            full((1, E)), full((1, E)),                     # layernorm1
            full((E, H)), full((1, H)),                     # ffn linear1
            full((H, E)), full((1, E)),                     # ffn linear2
            full((1, E)), full((1, E)),                     # layernorm2
        ],
        out_specs=pl.BlockSpec((1, R, E), lambda b: (b, 0, 0)),
        compiler_params=pltpu.CompilerParams(dimension_semantics=("parallel",)),
    )(x_r, pe_rows, neg_mask, wqkv_t, bqkv, wo_t, bo,
      g1, b1, w1_t, bf1, w2_t, bf2, g2, b2)

    return out_r.reshape(B, S, C, E)          # free reshape back to the original layout


# -------------------------- pure-JAX reference ----------------------------- #

def reference_forward(x, params, *, num_heads):
    B, S, C, E = x.shape
    Dh = E // num_heads
    x = x + params["pe"][:C][None, None, :, :]
    xf = jnp.transpose(x, (0, 2, 1, 3))                        # (B, C, S, E)
    qkv = jnp.einsum("bcse,fe->bcsf", xf, params["in_proj_weight"]) + params["in_proj_bias"]
    q, k, v = jnp.split(qkv, 3, axis=-1)

    def heads(t):
        return t.reshape(B, C, S, num_heads, Dh).transpose(0, 1, 3, 2, 4)

    qh, kh, vh = heads(q), heads(k), heads(v)
    s = jnp.einsum("bchqd,bchkd->bchqk", qh, kh) / math.sqrt(Dh)
    causal = jnp.triu(jnp.ones((S, S), bool), k=1)
    s = jnp.where(causal, -1e30, s)
    p = jax.nn.softmax(s, axis=-1)
    ctx = jnp.einsum("bchqk,bchkd->bchqd", p, vh)
    ctx = ctx.transpose(0, 1, 3, 2, 4).reshape(B, C, S, E)
    attn = jnp.einsum("bcse,fe->bcsf", ctx, params["out_proj_weight"]) + params["out_proj_bias"]

    def ln(t, g, b):
        mu = t.mean(-1, keepdims=True)
        var = ((t - mu) ** 2).mean(-1, keepdims=True)
        return (t - mu) / jnp.sqrt(var + 1e-5) * g + b

    y = ln(xf + attn, params["ln1_gamma"], params["ln1_beta"])
    hdn = jax.nn.relu(jnp.einsum("bcse,he->bcsh", y, params["w1"]) + params["b1"])
    ff = jnp.einsum("bcsh,eh->bcse", hdn, params["w2"]) + params["b2"]
    out = ln(y + ff, params["ln2_gamma"], params["ln2_beta"])
    return out.transpose(0, 2, 1, 3)


# ----------------------------- parameter init ------------------------------ #

def init_params(key, input_dim, hidden_dim, max_len=64):
    E, H = input_dim, hidden_dim
    ks = jax.random.split(key, 6)
    scale = 0.05
    # PositionalEncoding buffer (deterministic formula, same as PyTorch)
    position = jnp.arange(max_len, dtype=jnp.float32)[:, None]
    div_term = jnp.exp(jnp.arange(0, E, 2, dtype=jnp.float32) * (-math.log(10000.0) / E))
    pe = jnp.zeros((max_len, E), jnp.float32)
    pe = pe.at[:, 0::2].set(jnp.sin(position * div_term))
    pe = pe.at[:, 1::2].set(jnp.cos(position * div_term))
    return dict(
        pe=pe,
        in_proj_weight=scale * jax.random.normal(ks[0], (3 * E, E), jnp.float32),
        in_proj_bias=scale * jax.random.normal(ks[1], (3 * E,), jnp.float32),
        out_proj_weight=scale * jax.random.normal(ks[2], (E, E), jnp.float32),
        out_proj_bias=jnp.zeros((E,), jnp.float32),
        ln1_gamma=jnp.ones((E,), jnp.float32),
        ln1_beta=jnp.zeros((E,), jnp.float32),
        w1=scale * jax.random.normal(ks[3], (H, E), jnp.float32),
        b1=scale * jax.random.normal(ks[4], (H,), jnp.float32),
        w2=scale * jax.random.normal(ks[5], (E, H), jnp.float32),
        b2=jnp.zeros((E,), jnp.float32),
        ln2_gamma=jnp.ones((E,), jnp.float32),
        ln2_beta=jnp.zeros((E,), jnp.float32),
    )


# ---------------------------------- main ----------------------------------- #

if __name__ == "__main__":
    # small shapes consistent with the module's forward: x is (B, S, C, E)
    B, S, C = 2, 8, 4           # batch, seq_len (hist_len), num_cities
    E, HID, NHEADS = 32, 64, 2  # input_dim, hidden_dim, num_heads

    key = jax.random.PRNGKey(0)
    k_x, k_p = jax.random.split(key)
    x = jax.random.normal(k_x, (B, S, C, E), jnp.float32)
    params = init_params(k_p, E, HID)

    out = transformer_with_pe_forward(x, params, num_heads=NHEADS)
    out = jax.block_until_ready(out)

    ref = jax.block_until_ready(reference_forward(x, params, num_heads=NHEADS))
    # bf16 MXU inputs (f32 accumulation) -> slightly looser tolerance than pure f32.
    np.testing.assert_allclose(np.asarray(out), np.asarray(ref), atol=5e-3, rtol=5e-3)

    print("KERNEL_OK")
</pallas_src>

<mosaic_0001>
module attributes {stable_mosaic.version = 11 : i64} {
  func.func @_transformer_block_kernel(%arg0: i32, %arg1: memref<1x32x32xf32, #tpu.memory_space<vmem>>, %arg2: memref<32x32xf32, #tpu.memory_space<vmem>>, %arg3: memref<32x32xf32, #tpu.memory_space<vmem>>, %arg4: memref<32x96xbf16, #tpu.memory_space<vmem>>, %arg5: memref<1x96xf32, #tpu.memory_space<vmem>>, %arg6: memref<32x32xbf16, #tpu.memory_space<vmem>>, %arg7: memref<1x32xf32, #tpu.memory_space<vmem>>, %arg8: memref<1x32xf32, #tpu.memory_space<vmem>>, %arg9: memref<1x32xf32, #tpu.memory_space<vmem>>, %arg10: memref<32x64xbf16, #tpu.memory_space<vmem>>, %arg11: memref<1x64xf32, #tpu.memory_space<vmem>>, %arg12: memref<64x32xbf16, #tpu.memory_space<vmem>>, %arg13: memref<1x32xf32, #tpu.memory_space<vmem>>, %arg14: memref<1x32xf32, #tpu.memory_space<vmem>>, %arg15: memref<1x32xf32, #tpu.memory_space<vmem>>, %arg16: memref<1x32x32xf32, #tpu.memory_space<vmem>>) attributes {dimension_semantics = [#tpu.dimension_semantics<parallel>], iteration_bounds = array<i64: 2>, scalar_prefetch = 0 : i64, scratch_operands = 0 : i64, tpu.core_type = #tpu.core_type<tc>, window_params = [{transform_indices = @transform_0, window_bounds = array<i64: 1, 32, 32>}, {pipeline_mode = #tpu.pipeline_mode<synchronous>, transform_indices = @transform_1, window_bounds = array<i64: 32, 32>}, {pipeline_mode = #tpu.pipeline_mode<synchronous>, transform_indices = @transform_2, window_bounds = array<i64: 32, 32>}, {pipeline_mode = #tpu.pipeline_mode<synchronous>, transform_indices = @transform_3, window_bounds = array<i64: 32, 96>}, {pipeline_mode = #tpu.pipeline_mode<synchronous>, transform_indices = @transform_4, window_bounds = array<i64: 1, 96>}, {pipeline_mode = #tpu.pipeline_mode<synchronous>, transform_indices = @transform_5, window_bounds = array<i64: 32, 32>}, {pipeline_mode = #tpu.pipeline_mode<synchronous>, transform_indices = @transform_6, window_bounds = array<i64: 1, 32>}, {pipeline_mode = #tpu.pipeline_mode<synchronous>, transform_indices = @transform_7, window_bounds = array<i64: 1, 32>}, {pipeline_mode = #tpu.pipeline_mode<synchronous>, transform_indices = @transform_8, window_bounds = array<i64: 1, 32>}, {pipeline_mode = #tpu.pipeline_mode<synchronous>, transform_indices = @transform_9, window_bounds = array<i64: 32, 64>}, {pipeline_mode = #tpu.pipeline_mode<synchronous>, transform_indices = @transform_10, window_bounds = array<i64: 1, 64>}, {pipeline_mode = #tpu.pipeline_mode<synchronous>, transform_indices = @transform_11, window_bounds = array<i64: 64, 32>}, {pipeline_mode = #tpu.pipeline_mode<synchronous>, transform_indices = @transform_12, window_bounds = array<i64: 1, 32>}, {pipeline_mode = #tpu.pipeline_mode<synchronous>, transform_indices = @transform_13, window_bounds = array<i64: 1, 32>}, {pipeline_mode = #tpu.pipeline_mode<synchronous>, transform_indices = @transform_14, window_bounds = array<i64: 1, 32>}, {transform_indices = @transform_15, window_bounds = array<i64: 1, 32, 32>}]} {
    %c0 = arith.constant 0 : index
    %c0_0 = arith.constant 0 : index
    %c0_1 = arith.constant 0 : index
    %0 = vector.load %arg1[%c0, %c0_0, %c0_1] : memref<1x32x32xf32, #tpu.memory_space<vmem>>, vector<1x32x32xf32>
    %1 = vector.shape_cast %0 : vector<1x32x32xf32> to vector<32x32xf32>
    %c0_2 = arith.constant 0 : index
    %c0_3 = arith.constant 0 : index
    %2 = vector.load %arg2[%c0_2, %c0_3] : memref<32x32xf32, #tpu.memory_space<vmem>>, vector<32x32xf32>
    %3 = arith.addf %1, %2 : vector<32x32xf32>
    %4 = arith.truncf %3 : vector<32x32xf32> to vector<32x32xbf16>
    %c0_4 = arith.constant 0 : index
    %c0_5 = arith.constant 0 : index
    %5 = vector.load %arg4[%c0_4, %c0_5] : memref<32x96xbf16, #tpu.memory_space<vmem>>, vector<32x96xbf16>
    %cst = arith.constant dense<0.000000e+00> : vector<32x96xf32>
    %6 = tpu.matmul %4, %5, %cst {dimension_numbers = #tpu.dot_dimension_numbers<[1], [0], [0], [1], [0, 0, 1, 1], [], []>} : vector<32x32xbf16>, vector<32x96xbf16>, vector<32x96xf32> -> vector<32x96xf32>
    %c0_6 = arith.constant 0 : index
    %c0_7 = arith.constant 0 : index
    %7 = vector.load %arg5[%c0_6, %c0_7] : memref<1x96xf32, #tpu.memory_space<vmem>>, vector<1x96xf32>
    %8 = vector.broadcast %7 : vector<1x96xf32> to vector<32x96xf32>
    %9 = arith.addf %6, %8 : vector<32x96xf32>
    %c0_8 = arith.constant 0 : index
    %c0_9 = arith.constant 0 : index
    %10 = vector.load %arg3[%c0_8, %c0_9] : memref<32x32xf32, #tpu.memory_space<vmem>>, vector<32x32xf32>
    %11 = vector.extract_strided_slice %9 {offsets = [0, 0], sizes = [32, 16], strides = [1, 1]} : vector<32x96xf32> to vector<32x16xf32>
    %cst_10 = arith.constant 2.500000e-01 : f32
    %12 = vector.broadcast %cst_10 : f32 to vector<32x16xf32>
    %13 = arith.mulf %11, %12 : vector<32x16xf32>
    %14 = arith.truncf %13 : vector<32x16xf32> to vector<32x16xbf16>
    %15 = vector.extract_strided_slice %9 {offsets = [0, 32], sizes = [32, 16], strides = [1, 1]} : vector<32x96xf32> to vector<32x16xf32>
    %16 = arith.truncf %15 : vector<32x16xf32> to vector<32x16xbf16>
    %17 = vector.extract_strided_slice %9 {offsets = [0, 64], sizes = [32, 16], strides = [1, 1]} : vector<32x96xf32> to vector<32x16xf32>
    %18 = arith.truncf %17 : vector<32x16xf32> to vector<32x16xbf16>
    %cst_11 = arith.constant dense<0.000000e+00> : vector<32x32xf32>
    %19 = tpu.matmul %14, %16, %cst_11 {dimension_numbers = #tpu.dot_dimension_numbers<[1], [1], [0], [0], [0, 0, 1, 0], [], []>} : vector<32x16xbf16>, vector<32x16xbf16>, vector<32x32xf32> -> vector<32x32xf32>
    %20 = arith.addf %19, %10 : vector<32x32xf32>
    %cst_12 = arith.constant dense<0xFF800000> : vector<32xf32>
    %21 = vector.multi_reduction <maximumf>, %20, %cst_12 [1] : vector<32x32xf32> to vector<32xf32>
    %22 = vector.shape_cast %21 : vector<32xf32> to vector<32x1xf32>
    %23 = vector.broadcast %22 : vector<32x1xf32> to vector<32x32xf32>
    %24 = arith.subf %20, %23 : vector<32x32xf32>
    %25 = math.exp %24 : vector<32x32xf32>
    %cst_13 = arith.constant dense<0.000000e+00> : vector<32xf32>
    %26 = vector.multi_reduction <add>, %25, %cst_13 [1] : vector<32x32xf32> to vector<32xf32>
    %27 = vector.shape_cast %26 : vector<32xf32> to vector<32x1xf32>
    %28 = tpu.reciprocal %27 {approx = true} : vector<32x1xf32> -> vector<32x1xf32>
    %29 = vector.broadcast %28 : vector<32x1xf32> to vector<32x32xf32>
    %30 = arith.mulf %25, %29 : vector<32x32xf32>
    %31 = arith.truncf %30 : vector<32x32xf32> to vector<32x32xbf16>
    %cst_14 = arith.constant dense<0.000000e+00> : vector<32x16xf32>
    %32 = tpu.matmul %31, %18, %cst_14 {dimension_numbers = #tpu.dot_dimension_numbers<[1], [0], [0], [1], [0, 0, 1, 1], [], []>} : vector<32x32xbf16>, vector<32x16xbf16>, vector<32x16xf32> -> vector<32x16xf32>
    %33 = vector.extract_strided_slice %9 {offsets = [0, 16], sizes = [32, 16], strides = [1, 1]} : vector<32x96xf32> to vector<32x16xf32>
    %cst_15 = arith.constant 2.500000e-01 : f32
    %34 = vector.broadcast %cst_15 : f32 to vector<32x16xf32>
    %35 = arith.mulf %33, %34 : vector<32x16xf32>
    %36 = arith.truncf %35 : vector<32x16xf32> to vector<32x16xbf16>
    %37 = vector.extract_strided_slice %9 {offsets = [0, 48], sizes = [32, 16], strides = [1, 1]} : vector<32x96xf32> to vector<32x16xf32>
    %38 = arith.truncf %37 : vector<32x16xf32> to vector<32x16xbf16>
    %39 = vector.extract_strided_slice %9 {offsets = [0, 80], sizes = [32, 16], strides = [1, 1]} : vector<32x96xf32> to vector<32x16xf32>
    %40 = arith.truncf %39 : vector<32x16xf32> to vector<32x16xbf16>
    %cst_16 = arith.constant dense<0.000000e+00> : vector<32x32xf32>
    %41 = tpu.matmul %36, %38, %cst_16 {dimension_numbers = #tpu.dot_dimension_numbers<[1], [1], [0], [0], [0, 0, 1, 0], [], []>} : vector<32x16xbf16>, vector<32x16xbf16>, vector<32x32xf32> -> vector<32x32xf32>
    %42 = arith.addf %41, %10 : vector<32x32xf32>
    %cst_17 = arith.constant dense<0xFF800000> : vector<32xf32>
    %43 = vector.multi_reduction <maximumf>, %42, %cst_17 [1] : vector<32x32xf32> to vector<32xf32>
    %44 = vector.shape_cast %43 : vector<32xf32> to vector<32x1xf32>
    %45 = vector.broadcast %44 : vector<32x1xf32> to vector<32x32xf32>
    %46 = arith.subf %42, %45 : vector<32x32xf32>
    %47 = math.exp %46 : vector<32x32xf32>
    %cst_18 = arith.constant dense<0.000000e+00> : vector<32xf32>
    %48 = vector.multi_reduction <add>, %47, %cst_18 [1] : vector<32x32xf32> to vector<32xf32>
    %49 = vector.shape_cast %48 : vector<32xf32> to vector<32x1xf32>
    %50 = tpu.reciprocal %49 {approx = true} : vector<32x1xf32> -> vector<32x1xf32>
    %51 = vector.broadcast %50 : vector<32x1xf32> to vector<32x32xf32>
    %52 = arith.mulf %47, %51 : vector<32x32xf32>
    %53 = arith.truncf %52 : vector<32x32xf32> to vector<32x32xbf16>
    %cst_19 = arith.constant dense<0.000000e+00> : vector<32x16xf32>
    %54 = tpu.matmul %53, %40, %cst_19 {dimension_numbers = #tpu.dot_dimension_numbers<[1], [0], [0], [1], [0, 0, 1, 1], [], []>} : vector<32x32xbf16>, vector<32x16xbf16>, vector<32x16xf32> -> vector<32x16xf32>
    %55 = tpu.concatenate %32, %54 in 1 : vector<32x16xf32>, vector<32x16xf32> -> vector<32x32xf32>
    %56 = arith.truncf %55 : vector<32x32xf32> to vector<32x32xbf16>
    %c0_20 = arith.constant 0 : index
    %c0_21 = arith.constant 0 : index
    %57 = vector.load %arg6[%c0_20, %c0_21] : memref<32x32xbf16, #tpu.memory_space<vmem>>, vector<32x32xbf16>
    %cst_22 = arith.constant dense<0.000000e+00> : vector<32x32xf32>
    %58 = tpu.matmul %56, %57, %cst_22 {dimension_numbers = #tpu.dot_dimension_numbers<[1], [0], [0], [1], [0, 0, 1, 1], [], []>} : vector<32x32xbf16>, vector<32x32xbf16>, vector<32x32xf32> -> vector<32x32xf32>
    %c0_23 = arith.constant 0 : index
    %c0_24 = arith.constant 0 : index
    %59 = vector.load %arg7[%c0_23, %c0_24] : memref<1x32xf32, #tpu.memory_space<vmem>>, vector<1x32xf32>
    %60 = vector.broadcast %59 : vector<1x32xf32> to vector<32x32xf32>
    %61 = arith.addf %58, %60 : vector<32x32xf32>
    %62 = arith.addf %3, %61 : vector<32x32xf32>
    %cst_25 = arith.constant dense<0.000000e+00> : vector<32xf32>
    %63 = vector.multi_reduction <add>, %62, %cst_25 [1] : vector<32x32xf32> to vector<32xf32>
    %64 = vector.shape_cast %63 : vector<32xf32> to vector<32x1xf32>
    %cst_26 = arith.constant 3.200000e+01 : f32
    %65 = vector.broadcast %cst_26 : f32 to vector<32x1xf32>
    %66 = arith.divf %64, %65 : vector<32x1xf32>
    %67 = vector.broadcast %66 : vector<32x1xf32> to vector<32x32xf32>
    %68 = arith.subf %62, %67 : vector<32x32xf32>
    %69 = arith.mulf %68, %68 : vector<32x32xf32>
    %cst_27 = arith.constant dense<0.000000e+00> : vector<32xf32>
    %70 = vector.multi_reduction <add>, %69, %cst_27 [1] : vector<32x32xf32> to vector<32xf32>
    %71 = vector.shape_cast %70 : vector<32xf32> to vector<32x1xf32>
    %cst_28 = arith.constant 3.200000e+01 : f32
    %72 = vector.broadcast %cst_28 : f32 to vector<32x1xf32>
    %73 = arith.divf %71, %72 : vector<32x1xf32>
    %74 = vector.broadcast %66 : vector<32x1xf32> to vector<32x32xf32>
    %75 = arith.subf %62, %74 : vector<32x32xf32>
    %cst_29 = arith.constant 9.99999974E-6 : f32
    %76 = vector.broadcast %cst_29 : f32 to vector<32x1xf32>
    %77 = arith.addf %73, %76 : vector<32x1xf32>
    %78 = math.rsqrt %77 : vector<32x1xf32>
    %79 = vector.broadcast %78 : vector<32x1xf32> to vector<32x32xf32>
    %80 = arith.mulf %75, %79 : vector<32x32xf32>
    %c0_30 = arith.constant 0 : index
    %c0_31 = arith.constant 0 : index
    %81 = vector.load %arg8[%c0_30, %c0_31] : memref<1x32xf32, #tpu.memory_space<vmem>>, vector<1x32xf32>
    %82 = vector.broadcast %81 : vector<1x32xf32> to vector<32x32xf32>
    %83 = arith.mulf %80, %82 : vector<32x32xf32>
    %c0_32 = arith.constant 0 : index
    %c0_33 = arith.constant 0 : index
    %84 = vector.load %arg9[%c0_32, %c0_33] : memref<1x32xf32, #tpu.memory_space<vmem>>, vector<1x32xf32>
    %85 = vector.broadcast %84 : vector<1x32xf32> to vector<32x32xf32>
    %86 = arith.addf %83, %85 : vector<32x32xf32>
    %87 = arith.truncf %86 : vector<32x32xf32> to vector<32x32xbf16>
    %c0_34 = arith.constant 0 : index
    %c0_35 = arith.constant 0 : index
    %88 = vector.load %arg10[%c0_34, %c0_35] : memref<32x64xbf16, #tpu.memory_space<vmem>>, vector<32x64xbf16>
    %cst_36 = arith.constant dense<0.000000e+00> : vector<32x64xf32>
    %89 = tpu.matmul %87, %88, %cst_36 {dimension_numbers = #tpu.dot_dimension_numbers<[1], [0], [0], [1], [0, 0, 1, 1], [], []>} : vector<32x32xbf16>, vector<32x64xbf16>, vector<32x64xf32> -> vector<32x64xf32>
    %c0_37 = arith.constant 0 : index
    %c0_38 = arith.constant 0 : index
    %90 = vector.load %arg11[%c0_37, %c0_38] : memref<1x64xf32, #tpu.memory_space<vmem>>, vector<1x64xf32>
    %91 = vector.broadcast %90 : vector<1x64xf32> to vector<32x64xf32>
    %92 = arith.addf %89, %91 : vector<32x64xf32>
    %cst_39 = arith.constant 0.000000e+00 : f32
    %93 = vector.broadcast %cst_39 : f32 to vector<32x64xf32>
    %94 = arith.maximumf %92, %93 : vector<32x64xf32>
    %95 = arith.truncf %94 : vector<32x64xf32> to vector<32x64xbf16>
    %c0_40 = arith.constant 0 : index
    %c0_41 = arith.constant 0 : index
    %96 = vector.load %arg12[%c0_40, %c0_41] : memref<64x32xbf16, #tpu.memory_space<vmem>>, vector<64x32xbf16>
    %cst_42 = arith.constant dense<0.000000e+00> : vector<32x32xf32>
    %97 = tpu.matmul %95, %96, %cst_42 {dimension_numbers = #tpu.dot_dimension_numbers<[1], [0], [0], [1], [0, 0, 1, 1], [], []>} : vector<32x64xbf16>, vector<64x32xbf16>, vector<32x32xf32> -> vector<32x32xf32>
    %c0_43 = arith.constant 0 : index
    %c0_44 = arith.constant 0 : index
    %98 = vector.load %arg13[%c0_43, %c0_44] : memref<1x32xf32, #tpu.memory_space<vmem>>, vector<1x32xf32>
    %99 = vector.broadcast %98 : vector<1x32xf32> to vector<32x32xf32>
    %100 = arith.addf %97, %99 : vector<32x32xf32>
    %101 = arith.addf %86, %100 : vector<32x32xf32>
    %cst_45 = arith.constant dense<0.000000e+00> : vector<32xf32>
    %102 = vector.multi_reduction <add>, %101, %cst_45 [1] : vector<32x32xf32> to vector<32xf32>
    %103 = vector.shape_cast %102 : vector<32xf32> to vector<32x1xf32>
    %cst_46 = arith.constant 3.200000e+01 : f32
    %104 = vector.broadcast %cst_46 : f32 to vector<32x1xf32>
    %105 = arith.divf %103, %104 : vector<32x1xf32>
    %106 = vector.broadcast %105 : vector<32x1xf32> to vector<32x32xf32>
    %107 = arith.subf %101, %106 : vector<32x32xf32>
    %108 = arith.mulf %107, %107 : vector<32x32xf32>
    %cst_47 = arith.constant dense<0.000000e+00> : vector<32xf32>
    %109 = vector.multi_reduction <add>, %108, %cst_47 [1] : vector<32x32xf32> to vector<32xf32>
    %110 = vector.shape_cast %109 : vector<32xf32> to vector<32x1xf32>
    %cst_48 = arith.constant 3.200000e+01 : f32
    %111 = vector.broadcast %cst_48 : f32 to vector<32x1xf32>
    %112 = arith.divf %110, %111 : vector<32x1xf32>
    %113 = vector.broadcast %105 : vector<32x1xf32> to vector<32x32xf32>
    %114 = arith.subf %101, %113 : vector<32x32xf32>
    %cst_49 = arith.constant 9.99999974E-6 : f32
    %115 = vector.broadcast %cst_49 : f32 to vector<32x1xf32>
    %116 = arith.addf %112, %115 : vector<32x1xf32>
    %117 = math.rsqrt %116 : vector<32x1xf32>
    %118 = vector.broadcast %117 : vector<32x1xf32> to vector<32x32xf32>
    %119 = arith.mulf %114, %118 : vector<32x32xf32>
    %c0_50 = arith.constant 0 : index
    %c0_51 = arith.constant 0 : index
    %120 = vector.load %arg14[%c0_50, %c0_51] : memref<1x32xf32, #tpu.memory_space<vmem>>, vector<1x32xf32>
    %121 = vector.broadcast %120 : vector<1x32xf32> to vector<32x32xf32>
    %122 = arith.mulf %119, %121 : vector<32x32xf32>
    %c0_52 = arith.constant 0 : index
    %c0_53 = arith.constant 0 : index
    %123 = vector.load %arg15[%c0_52, %c0_53] : memref<1x32xf32, #tpu.memory_space<vmem>>, vector<1x32xf32>
    %124 = vector.broadcast %123 : vector<1x32xf32> to vector<32x32xf32>
    %125 = arith.addf %122, %124 : vector<32x32xf32>
    %c0_54 = arith.constant 0 : index
    %c0_55 = arith.constant 0 : index
    %c0_56 = arith.constant 0 : index
    %126 = vector.load %arg16[%c0_54, %c0_55, %c0_56] : memref<1x32x32xf32, #tpu.memory_space<vmem>>, vector<1x32x32xf32>
    %127 = vector.shape_cast %126 : vector<1x32x32xf32> to vector<32x32xf32>
    %128 = vector.shape_cast %125 : vector<32x32xf32> to vector<1x32x32xf32>
    tpu.vector_store %arg16[%c0_54, %c0_55, %c0_56], %128 {strides = array<i32>} : memref<1x32x32xf32, #tpu.memory_space<vmem>>, vector<1x32x32xf32>,
    return
  }
  func.func @transform_0(%arg0: i32) -> (i32, i32, i32) {
    %c0_i32 = arith.constant 0 : i32
    %c0_i32_0 = arith.constant 0 : i32
    %c0_i32_1 = arith.constant 0 : i32
    return %arg0, %c0_i32, %c0_i32_0 : i32, i32, i32
  }
  func.func @transform_1(%arg0: i32) -> (i32, i32) {
    %c0_i32 = arith.constant 0 : i32
    %c0_i32_0 = arith.constant 0 : i32
    %c0_i32_1 = arith.constant 0 : i32
    return %c0_i32, %c0_i32_0 : i32, i32
  }
  func.func @transform_2(%arg0: i32) -> (i32, i32) {
    %c0_i32 = arith.constant 0 : i32
    %c0_i32_0 = arith.constant 0 : i32
    %c0_i32_1 = arith.constant 0 : i32
    return %c0_i32, %c0_i32_0 : i32, i32
  }
  func.func @transform_3(%arg0: i32) -> (i32, i32) {
    %c0_i32 = arith.constant 0 : i32
    %c0_i32_0 = arith.constant 0 : i32
    %c0_i32_1 = arith.constant 0 : i32
    return %c0_i32, %c0_i32_0 : i32, i32
  }
  func.func @transform_4(%arg0: i32) -> (i32, i32) {
    %c0_i32 = arith.constant 0 : i32
    %c0_i32_0 = arith.constant 0 : i32
    %c0_i32_1 = arith.constant 0 : i32
    return %c0_i32, %c0_i32_0 : i32, i32
  }
  func.func @transform_5(%arg0: i32) -> (i32, i32) {
    %c0_i32 = arith.constant 0 : i32
    %c0_i32_0 = arith.constant 0 : i32
    %c0_i32_1 = arith.constant 0 : i32
    return %c0_i32, %c0_i32_0 : i32, i32
  }
  func.func @transform_6(%arg0: i32) -> (i32, i32) {
    %c0_i32 = arith.constant 0 : i32
    %c0_i32_0 = arith.constant 0 : i32
    %c0_i32_1 = arith.constant 0 : i32
    return %c0_i32, %c0_i32_0 : i32, i32
  }
  func.func @transform_7(%arg0: i32) -> (i32, i32) {
    %c0_i32 = arith.constant 0 : i32
    %c0_i32_0 = arith.constant 0 : i32
    %c0_i32_1 = arith.constant 0 : i32
    return %c0_i32, %c0_i32_0 : i32, i32
  }
  func.func @transform_8(%arg0: i32) -> (i32, i32) {
    %c0_i32 = arith.constant 0 : i32
    %c0_i32_0 = arith.constant 0 : i32
    %c0_i32_1 = arith.constant 0 : i32
    return %c0_i32, %c0_i32_0 : i32, i32
  }
  func.func @transform_9(%arg0: i32) -> (i32, i32) {
    %c0_i32 = arith.constant 0 : i32
    %c0_i32_0 = arith.constant 0 : i32
    %c0_i32_1 = arith.constant 0 : i32
    return %c0_i32, %c0_i32_0 : i32, i32
  }
  func.func @transform_10(%arg0: i32) -> (i32, i32) {
    %c0_i32 = arith.constant 0 : i32
    %c0_i32_0 = arith.constant 0 : i32
    %c0_i32_1 = arith.constant 0 : i32
    return %c0_i32, %c0_i32_0 : i32, i32
  }
  func.func @transform_11(%arg0: i32) -> (i32, i32) {
    %c0_i32 = arith.constant 0 : i32
    %c0_i32_0 = arith.constant 0 : i32
    %c0_i32_1 = arith.constant 0 : i32
    return %c0_i32, %c0_i32_0 : i32, i32
  }
  func.func @transform_12(%arg0: i32) -> (i32, i32) {
    %c0_i32 = arith.constant 0 : i32
    %c0_i32_0 = arith.constant 0 : i32
    %c0_i32_1 = arith.constant 0 : i32
    return %c0_i32, %c0_i32_0 : i32, i32
  }
  func.func @transform_13(%arg0: i32) -> (i32, i32) {
    %c0_i32 = arith.constant 0 : i32
    %c0_i32_0 = arith.constant 0 : i32
    %c0_i32_1 = arith.constant 0 : i32
    return %c0_i32, %c0_i32_0 : i32, i32
  }
  func.func @transform_14(%arg0: i32) -> (i32, i32) {
    %c0_i32 = arith.constant 0 : i32
    %c0_i32_0 = arith.constant 0 : i32
    %c0_i32_1 = arith.constant 0 : i32
    return %c0_i32, %c0_i32_0 : i32, i32
  }
  func.func @transform_15(%arg0: i32) -> (i32, i32, i32) {
    %c0_i32 = arith.constant 0 : i32
    %c0_i32_0 = arith.constant 0 : i32
    %c0_i32_1 = arith.constant 0 : i32
    return %arg0, %c0_i32, %c0_i32_0 : i32, i32, i32
  }
}

</mosaic_0001>

<bundles_post_ra>
// kernel: tpu_custom_call.1
= control target key start
LH: loop header
LB: loop body
LE: loop exit
PB: predicated region body
PF: predicated region fallthrough
CT: control target
= control target key end

     0   :  { %s2708_s0 = inlined_call_operand.hbm [shape: f32[2,32,32], index: 0, kind: input, shape index: {}]   ;;  %s2709_s1 = inlined_call_operand.vmem [shape: f32[32,32], index: 1, kind: input, shape index: {}]   ;;  %s2710_s2 = inlined_call_operand.hbm [shape: f32[32,32], index: 2, kind: input, shape index: {}]   ;;  %s2711_s3 = inlined_call_operand.vmem [shape: bf16[32,96], index: 3, kind: input, shape index: {}]   ;;  %s2712_s4 = inlined_call_operand.vmem [shape: f32[1,96], index: 4, kind: input, shape index: {}]   ;;  %s2713_s5 = inlined_call_operand.hbm [shape: bf16[32,32], index: 5, kind: input, shape index: {}]   ;;  %s2714_s6 = inlined_call_operand.vmem [shape: f32[1,32], index: 6, kind: input, shape index: {}]   ;;  %s2715_s7 = inlined_call_operand.hbm [shape: f32[1,32], index: 7, kind: input, shape index: {}]   ;;  %s2716_s8 = inlined_call_operand.hbm [shape: f32[1,32], index: 8, kind: input, shape index: {}]   ;;  %s2717_s9 = inlined_call_operand.vmem [shape: bf16[32,64], index: 9, kind: input, shape index: {}]   ;;  %s2718_s10 = inlined_call_operand.vmem [shape: f32[1,64], index: 10, kind: input, shape index: {}]   ;;  %s2719_s11 = inlined_call_operand.vmem [shape: bf16[64,32], index: 11, kind: input, shape index: {}]   ;;  %s2720_s12 = inlined_call_operand.vmem [shape: f32[1,32], index: 12, kind: input, shape index: {}]   ;;  %s2721_s13 = inlined_call_operand.vmem [shape: f32[1,32], index: 13, kind: input, shape index: {}]   ;;  %s2722_s14 = inlined_call_operand.vmem [shape: f32[1,32], index: 14, kind: input, shape index: {}]   ;;  %s2723_s15 = inlined_call_operand.hbm [shape: f32[2,32,32], index: 15, kind: output, shape index: {}]  }
   0x1   :  { %2734 = sst [smem:[#allocation18_spill]] %s2717_s9 }
   0x2   :  { %2735 = sst [smem:[#allocation19_spill]] %s2718_s10 }
   0x3   :  { %2736 = sst [smem:[#allocation20_spill]] %s2719_s11 }
   0x4   :  { %2737 = sst [smem:[#allocation21_spill]] %s2720_s12 }
   0x5   :  { %2738 = sst [smem:[#allocation22_spill]] %s2721_s13 }
   0x6   :  { %2739 = sst [smem:[#allocation23_spill]] %s2722_s14 }
   0x7   :  { %2740 = sst [smem:[#allocation24_spill]] %s2723_s15 }
   0x8   :  { %20 = vsyncpa [#allocation3], 0 }
   0x9   :  { %22 = vsyncpa [#allocation3 + $0x1], 0 }
   0xa   :  { %23 = vsyncpa [#allocation6], 0 }
   0xb   :  { %24 = vsyncpa [#allocation9], 0 }
   0xc   :  { %25 = vsyncpa [#allocation4], 0 }
   0xd   :  { %27 = vsyncpa [#allocation4 + $0x1], 0  ;;  %s2240_s18 = smov 0   ;;  %s2242_s19 = smov 0  }
   0xe   :  { %s2244_s20 = smov 0   ;;  %s2246_s21 = smov 0  }
   0xf LB: > { %2741 = sst [smem:[#allocation16_spill]] %s2128_s18  ;;  %s2261_s22 = sadd.s32 4294967295, %s2140_s21   ;;  %s2140_s21 = sphi %s2246_s21, %s2773_s21   ;;  %s2136_s20 = sphi %s2244_s20, %s2772_s20   ;;  %s2132_s19 = sphi %s2242_s19, %s2771_s19   ;;  %s2128_s18 = sphi %s2240_s18, %s2770_s18  }
  0x10   : > { %s1593_s23 = sadd.s32 4294967294, %s2140_s21   ;;  %p53_p0 = scmp.ne.s32.totalorder %s2132_s19, %s2128_s18 }
  0x11   : > { %p2727_p1 = scmp.eq.s32.totalorder %s2261_s22, 0  ;;  %p377_p3 = scmp.eq.s32.totalorder %s1593_s23, 1 }
  0x12   : > { %p1594_p5 = scmp.ge.s32.totalorder %s2140_s21, 1  ;;  %p384_p7 = scmp.lt.s32.totalorder %s2140_s21, 3 }
  0x13   : > { %p2270_p4 = por %p2727_p1, %p53_p0  ;;  %p2275_p6 = por %p377_p3, %p53_p0 }
  0x14   : > { %p2280_p8 = pnand %p1594_p5, %p384_p7  ;;  %s2142_s27 = smov [#allocation5]  }
  0x15   : > { %s2742_s24 = scalar_select %p2270_p4, 1, 0 }
  0x16   : > { %s2743_s25 = scalar_select %p2275_p6, 1, 0 }
  0x17   : > { %s2745_s26 = scalar_select %p2280_p8, 1, 0 }
  0x18   : > { %2744 = sst [smem:[#allocation17_spill]] %s2743_s25  ;;  %s399_s28 = sshll.u32 %s2142_s27, 4  ;;  %s2284_s28 = int_to_ptr.vmem [resolvable:$true] %s399_s28 }
  0x19   : > { %p1777_p9 = pneg %p2280_p8  ;;  %s2143_s30 = smov [#allocation8]  }
  0x1a   : > { %s435_s16 = sshll.u32 %s2143_s30, 4  ;;  %s2144_s17 = smov [#allocation7]   ;;  %s2295_s16 = int_to_ptr.vmem [resolvable:$true] %s435_s16 }
  0x1b   : > { %p2291_p11 = pnand %p1777_p9, %p2727_p1  ;;  %s2297_s23 = sshll.u32 %s2144_s17, 4  ;;  %s419_s23 = int_to_ptr.vmem [resolvable:$true] %s2297_s23 }
  0x1c   : > { %s1924_s18 = scalar_lea.hbm %s2710_s2, 512 }
  0x1d   : > { %p1925_p12 = scmp.ne.s32.totalorder %s2710_s2, %s1924_s18  ;;  %p2307_p13 = pneg %p2291_p11 }
  0x1e   : > { %p1931_p5 = scmp.lt.u32.totalorder %s1924_s18, %s2710_s2 }
  0x1f   : > { %p1927_p0 = pnand %p2307_p13, %p1925_p12 }
  0x21   : > { %p1928_p3 = pneg %p1927_p0 }
  0x23   : > { %p1933_p7 = pnand %p1931_p5, %p1928_p3 }
  0x25   : > { %1936 = shalt.err (!%p1933_p7)
}
  0x26   : > { %s1937_s14 = scalar_lea.vmem %s2284_s28, 512  ;;  %p1945_p2 = scmp.lt.s32.totalorder %s2284_s28, %s2284_s28 }
  0x27   : > { %p1938_p9 = scmp.ne.s32.totalorder %s2284_s28, %s1937_s14  ;;  %p1946_p6 = scmp.lt.s32.totalorder %s1937_s14, %s1937_s14 }
  0x29   : > { %p1940_p10 = pnand %p1938_p9, %p2307_p13  ;;  %p1947_p12 = por %p1946_p6, %p1945_p2 }
  0x2b   : > { %p1941_p1 = pneg %p1940_p10 }
  0x2d   : > { %p1948_p0 = pnand %p1947_p12, %p1941_p1 }
  0x2f   : > { %1951 = shalt.err (!%p1948_p0)
}
  0x30   : > { %s2732_s15 = smov 128   ;;  %s2733_s18 = smov 8  }
  0x31   : > { %1780 = dma.hbm_to_vmem [thread:$0]  (!%p2291_p11), %s2710_s2, 512, %s2284_s28, [#allocation6], %s2732_s15, %s2732_s15, %s2733_s18  }
  0x32   : > { %s1952_s14 = scalar_lea.hbm %s2715_s7, 16 }
  0x33   : > { %p1953_p1 = scmp.ne.s32.totalorder %s2715_s7, %s1952_s14  ;;  %p1959_p10 = scmp.lt.u32.totalorder %s1952_s14, %s2715_s7 }
  0x35   : > { %p1955_p2 = pnand %p1953_p1, %p2307_p13 }
  0x37   : > { %p1956_p6 = pneg %p1955_p2 }
  0x39   : > { %p1961_p3 = pnand %p1959_p10, %p1956_p6 }
  0x3b   : > { %1964 = shalt.err (!%p1961_p3)
}
  0x3c   : > { %s1965_s28 = scalar_lea.vmem %s2295_s16, 16  ;;  %s1972_s10 = scalar_lea.vmem %s2295_s16, 32 }
  0x3d   : > { %p1966_p5 = scmp.ne.s32.totalorder %s2295_s16, %s1965_s28  ;;  %p1973_p12 = scmp.lt.s32.totalorder %s2295_s16, %s2295_s16 }
  0x3e   : > { %p1974_p0 = scmp.lt.s32.totalorder %s1972_s10, %s1965_s28 }
  0x3f   : > { %p1968_p7 = pnand %p1966_p5, %p2307_p13 }
  0x40   : > { %p1975_p1 = por %p1974_p0, %p1973_p12 }
  0x41   : > { %p1969_p9 = pneg %p1968_p7 }
  0x43   : > { %p1976_p2 = pnand %p1975_p1, %p1969_p9 }
  0x45   : > { %1979 = shalt.err (!%p1976_p2)
}
  0x46   : > { %1786 = dma.hbm_to_vmem [thread:$0]  (!%p2291_p11), %s2715_s7, 16, %s2295_s16, [#allocation9]  }
  0x47   : > { %s1980_s27 = scalar_lea.hbm %s2713_s5, 256 }
  0x48   : > { %p1981_p6 = scmp.ne.s32.totalorder %s2713_s5, %s1980_s27  ;;  %p1987_p5 = scmp.lt.u32.totalorder %s1980_s27, %s2713_s5 }
  0x4a   : > { %p1983_p10 = pnand %p1981_p6, %p2307_p13 }
  0x4c   : > { %p1984_p3 = pneg %p1983_p10 }
  0x4e   : > { %p1989_p7 = pnand %p1987_p5, %p1984_p3 }
  0x50   : > { %1992 = shalt.err (!%p1989_p7)
}
  0x51   : > { %s1993_s10 = scalar_lea.vmem %s419_s23, 256  ;;  %p2001_p1 = scmp.lt.s32.totalorder %s419_s23, %s419_s23 }
  0x52   : > { %p1994_p9 = scmp.ne.s32.totalorder %s419_s23, %s1993_s10  ;;  %p2002_p2 = scmp.lt.s32.totalorder %s1993_s10, %s1993_s10 }
  0x54   : > { %p1996_p12 = pnand %p1994_p9, %p2307_p13  ;;  %p2003_p4 = por %p2002_p2, %p2001_p1 }
  0x56   : > { %p1997_p0 = pneg %p1996_p12 }
  0x58   : > { %p2004_p8 = pnand %p2003_p4, %p1997_p0 }
  0x5a   : > { %2007 = shalt.err (!%p2004_p8)
}
  0x5b   : > { %s2147_s16 = smov 64   ;;  %s2148_s9 = smov 4  }
  0x5c   : > { %1783 = dma.hbm_to_vmem [thread:$0]  (!%p2291_p11), %s2713_s5, 256, %s419_s23, [#allocation6], %s2147_s16, %s2147_s16, %s2148_s9  }
  0x5d   : > { %s2149_s25 = smov [#allocation10]   ;;  %s2008_s14 = scalar_lea.hbm %s2716_s8, 16 }
  0x5e   : > { %s446_s27 = sshll.u32 %s2149_s25, 4  ;;  %p2009_p4 = scmp.ne.s32.totalorder %s2716_s8, %s2008_s14  ;;  %s447_s27 = int_to_ptr.vmem [resolvable:$true] %s446_s27 }
  0x5f   : > { %p2015_p10 = scmp.lt.u32.totalorder %s2008_s14, %s2716_s8 }
  0x60   : > { %p2011_p8 = pnand %p2009_p4, %p2307_p13 }
  0x62   : > { %p2012_p6 = pneg %p2011_p8 }
  0x64   : > { %p2017_p3 = pnand %p2015_p10, %p2012_p6 }
  0x66   : > { %2020 = shalt.err (!%p2017_p3)
}
  0x67   : > { %s2021_s23 = scalar_lea.vmem %s447_s27, 16  ;;  %s2028_s16 = scalar_lea.vmem %s447_s27, 32 }
  0x68   : > { %p2022_p5 = scmp.ne.s32.totalorder %s447_s27, %s2021_s23  ;;  %p2029_p12 = scmp.lt.s32.totalorder %s447_s27, %s447_s27 }
  0x69   : > { %p2030_p0 = scmp.lt.s32.totalorder %s2028_s16, %s2021_s23 }
  0x6a   : > { %p2024_p7 = pnand %p2022_p5, %p2307_p13 }
  0x6b   : > { %p2031_p1 = por %p2030_p0, %p2029_p12 }
  0x6c   : > { %p2025_p9 = pneg %p2024_p7 }
  0x6e   : > { %p2032_p2 = pnand %p2031_p1, %p2025_p9 }
  0x70   : > { %2035 = shalt.err (!%p2032_p2)
}
  0x71   : > { %1789 = dma.hbm_to_vmem [thread:$0]  (!%p2291_p11), %s2716_s8, 16, %s447_s27, [#allocation9]  }
  0x72   : > { %s2393_s13 = sadd.s32 1, %s2140_s21   ;;  %s40_s15 = sadd.s32 1, %s2136_s20 }
  0x73   : > { %s37_s29 = ssub.s32 %s2140_s21, %s2393_s13  ;;  %p47_p13 = scmp.ne.s32.totalorder %s2136_s20, %s2132_s19 }
  0x74   : > { %p38_p4 = scmp.eq.s32.totalorder %s37_s29, 0  ;;  %p48_p8 = scmp.eq.s32.totalorder %s2140_s21, 0 }
  0x75   : > { %p2748_p6 = scmp.eq.s32.totalorder %s2261_s22, 1  ;;  %p1802_p3 = scmp.lt.s32.totalorder %s2140_s21, 2 }
  0x76   : > { %s2409_s12 = scalar_select %p38_p4, %s2136_s20, %s40_s15  }
  0x77   : > { %p2403_p10 = por %p2748_p6, %p47_p13  ;;  %p49_p5 = por %p48_p8, %p47_p13 }
  0x78   : > { %s475_s25 = sand.u32 1, %s2136_s20   ;;  %s1649_s27 = sshll.u32 %s2140_s21, 9 }
  0x79   : > { %s1600_s30 = sshll.u32 %s475_s25, 5  ;;  %s2416_s28 = scalar_lea.hbm %s2708_s0, %s1649_s27 }
  0x7a   : > { %s479_s10 = scalar_lea.vmem [#allocation2], %s1600_s30  ;;  %p2420_p11 = pnand %p1802_p3, %p49_p5 }
  0x7b   : > { %s486_s23 = sshll.u32 %s479_s10, 4  ;;  %s2424_s9 = scalar_lea.sflag [#allocation3], %s475_s25  ;;  %s2418_s23 = int_to_ptr.vmem [resolvable:$true] %s486_s23 }
  0x7c   : > { %s2036_s11 = scalar_lea.hbm %s2416_s28, 512  ;;  %p2038_p9 = pneg %p2420_p11 }
  0x7d   : > { %p2037_p7 = scmp.ne.s32.totalorder %s2416_s28, %s2036_s11  ;;  %s2041_s30 = scalar_lea.hbm %s2708_s0, 1024 }
  0x7e   : > { %p2042_p1 = scmp.lt.u32.totalorder %s2416_s28, %s2708_s0  ;;  %p2043_p2 = scmp.lt.u32.totalorder %s2041_s30, %s2036_s11 }
  0x7f   : > { %p2039_p12 = pnand %p2038_p9, %p2037_p7  ;;  %p2045_p4 = scmp.lt.u32.totalorder %s2036_s11, %s2416_s28 }
  0x80   : > { %p2044_p13 = por %p2043_p2, %p2042_p1 }
  0x81   : > { %p2040_p0 = pneg %p2039_p12 }
  0x82   : > { %p2046_p8 = por %p2045_p4, %p2044_p13 }
  0x84   : > { %p2047_p6 = pnand %p2046_p8, %p2040_p0 }
  0x86   : > { %2050 = shalt.err (!%p2047_p6)
}
  0x87   : > { %s2051_s25 = scalar_lea.vmem %s2418_s23, 512  ;;  %s2150_s14 = smov [#allocation2]  }
  0x88   : > { %p2052_p3 = scmp.ne.s32.totalorder %s2418_s23, %s2051_s25  ;;  %s2056_s10 = sshll.u32 %s2150_s14, 4  ;;  %s2057_s10 = int_to_ptr.vmem [resolvable:$false] %s2056_s10 }
  0x89   : > { %s2058_s15 = scalar_lea.vmem %s2057_s10, 1024  ;;  %p2059_p12 = scmp.lt.s32.totalorder %s2418_s23, %s2057_s10 }
  0x8a   : > { %p2054_p5 = pnand %p2052_p3, %p2038_p9  ;;  %p2060_p1 = scmp.lt.s32.totalorder %s2058_s15, %s2051_s25 }
  0x8c   : > { %p2055_p7 = pneg %p2054_p5  ;;  %p2061_p2 = por %p2060_p1, %p2059_p12 }
  0x8e   : > { %p2062_p13 = pnand %p2061_p2, %p2055_p7 }
  0x90   : > { %2065 = shalt.err (!%p2062_p13)
}
  0x91   : > { %s2751_s11 = smov 8   ;;  %s2752_s29 = smov 128  }
  0x92   : > { %1793 = dma.hbm_to_vmem [thread:$0]  (!%p2420_p11), %s2416_s28, 512, %s2418_s23, %s2424_s9, %s2752_s29, %s2752_s29, %s2751_s11  }
  0x93   : > { %p2753_p9 = scmp.ne.s32.totalorder %s2745_s26, 0 }
  0x94   : > { %s2458_s30 = sand.u32 (!%p2753_p9), 1, %s2132_s19   ;;  %p2754_p0 = scmp.ne.s32.totalorder (!%p2753_p9), %s2742_s24, 0 }
  0x95   : > { %498 = sbr.rel (%p2753_p9) target bundleno = 3281 (0xcd1), region = 80  ;;  %s1604_s27 = sshll.u32 (!%p2753_p9), %s2458_s30, 5 }
  0x96   : > { %s501_s17 = scalar_lea.sflag (!%p2753_p9), [#allocation3], %s2458_s30  ;;  %s504_s16 = scalar_lea.vmem (!%p2753_p9), [#allocation2], %s1604_s27 }
  0x9c   : > { %2111 = dma.done.wait (%p2754_p0), %s501_s17, 512  }
  0x9d   : > { %2113 = vsyncadd (%p2754_p0), %s501_s17, 4294966784  ;;  %p2755_p11 = scmp.eq.s32.totalorder %s2261_s22, 0 }
  0x9f   : > { %2115 = dma.done.wait (%p2755_p11), [#allocation6], 768   ;;  %p2756_p4 = pmov %p2755_p11 }
  0xa1   : > { %2117 = vsyncadd (%p2756_p4), [#allocation6], 4294966528  ;;  %p2757_p8 = pmov %p2756_p4 }
  0xa2   : > { %p2758_p6 = pmov %p2756_p4 }
  0xa3   : > { %2119 = dma.done.wait (%p2757_p8), [#allocation9], 32  }
  0xa4   : > { %2121 = vsyncadd (%p2758_p6), [#allocation9], 4294967264  ;;  %v1866_v0 = vld [vmem:[%s2711_s3] sm:$0xff]   ;;  %v1867_v1 = vld [vmem:[%s2711_s3 + $0x8] sm:$0xff]   ;;  %vm605_vm0 = vcmask 261120   ;;  %vm679_vm1 = vcmask 130048  }
  0xa5   : > { %1685 = vmatprep.subr.bf16.mxu0 %v1866_v0  ;;  %v568_v2 = vld [vmem:[%s504_s16] sm:$0xff]  ;;  %v569_v3 = vld [vmem:[%s504_s16 + $0x8] sm:$0xff]  ;;  %v570_v7 = vld [vmem:[%s504_s16 + $0x10] sm:$0xff]  ;;  %s2151_s28 = smov 96   ;;  %s2152_s23 = smov 64   ;;  %vm1330_vm2 = vcmask 523264  }
  0xa6   : > { %v572_v4 = vld [vmem:[%s2709_s1] sm:$0xff]  ;;  %1686 = vmatpush3.bf16.msra.mxu0 %v1866_v0  ;;  %v573_v5 = vld [vmem:[%s2709_s1 + $0x8] sm:$0xff]  ;;  %v571_v8 = vld [vmem:[%s504_s16 + $0x18] sm:$0xff]  ;;  %s2153_s9 = smov 80   ;;  %s2154_s24 = smov 112  }
  0xa7   : > { %v2488_v6 = vadd.f32 %v572_v4, %v568_v2  ;;  %1687 = vmatprep.subr.bf16.mxu0 %v1867_v1  ;;  %v2490_v9 = vadd.f32 %v573_v5, %v569_v3  ;;  %v574_v10 = vld [vmem:[%s2709_s1 + $0x10] sm:$0xff]  ;;  %v575_v11 = vld [vmem:[%s2709_s1 + $0x18] sm:$0xff]  ;;  %v1610_v16 = vld [vmem:[%s2712_s4] ss:$0 sm:$0xff]  ;;  %s2155_s25 = smov 48   ;;  %s2156_s14 = smov 16  }
  0xa8   : > { %v2498_v12 = vadd.f32 %v574_v10, %v570_v7  ;;  %v2500_v13 = vadd.f32 %v575_v11, %v571_v8  ;;  %v2529_v37 = vld [vmem:[#allocation5 + $0x10] sm:$0xff]  ;;  %v2531_v38 = vld [vmem:[#allocation5] sm:$0xff]  ;;  %v2534_v42 = vld [vmem:[#allocation5 + $0x8] sm:$0xff]  ;;  %s2759_s17 = sld [smem:[#allocation18_spill]]  ;;  %s2761_s26 = sld [smem:[#allocation19_spill]] }
  0xa9   : > { %v580_v14 = vpack.c.bf16 %v2490_v9, %v2488_v6  ;;  %v2540_v49 = vld [vmem:[#allocation5 + $0x18] sm:$0xff]  ;;  %s2763_s10 = sld [smem:[#allocation22_spill]]  ;;  %s2764_s29 = sld [smem:[#allocation23_spill]] }
  0xaa   : > { %1688 = vmatpush3.bf16.msra.mxu0 %v1867_v1  ;;  %v581_v15 = vpack.c.bf16 %v2500_v13, %v2498_v12  ;;  %s566_s16 = scalar_lea.vmem [#allocation11], %s1604_s27 }
  0xab   : > { %1689 = vmatprep.mubr.msk.bf16.mxu0 %vm605_vm0, %v580_v14 }
  0xad   : > { %1690 = vmatmul.mubr.msk.bf16.vlgmr.msra.gmra.mrb[0].mxu0 %vm605_vm0, %v581_v15 }
 0x180   : > { %v1691_v17 = vpop.f32.mrb[0].mxu0 }
 0x181   : > { %v655_v18 = vadd.f32 %v1691_v17, %v1610_v16  ;;  %v646_v19 = vpop.f32.mrb[1].mxu0 }
 0x182   : > { %v647_v20 = vadd.f32 %v1610_v16, %v646_v19  ;;  %v1692_v21 = vpop.f32.mrb[2].mxu0 }
 0x183   : > { %v658_v22 = vadd.f32 %v1692_v21, %v1610_v16  ;;  %v649_v23 = vpop.f32.mrb[3].mxu0  ;;  %v667_v25 = vmul.f32 0.25, %v655_v18 }
 0x184   : > { %v650_v24 = vadd.f32 %v1610_v16, %v649_v23  ;;  %v665_v28 = vmul.f32 0.25, %v647_v20 }
 0x185   : > { %v668_v26 = vmul.f32 0.25, %v658_v22  ;;  %v2511_v27 = vpack.c.bf16 %v658_v22, %v655_v18 }
 0x186   : > { %v666_v29 = vmul.f32 0.25, %v650_v24  ;;  %v2513_v30 = vpack.c.bf16 %v650_v24, %v647_v20 }
 0x187   : > { %v2515_v31 = vpack.c.bf16 %v668_v26, %v667_v25 }
 0x188   : > { %675 = vrot.lane.b32.xlu0 %v2513_v30, %s2151_s28  ;;  %v2518_v32 = vpack.c.bf16 %v666_v29, %v665_v28 }
 0x18a   : > { %1697 = vmatprep.mubr.msk.bf16.mxu1 %vm679_vm1, %v2518_v32 }
 0x18c   : > { %677 = vrot.lane.b32.xlu0 %v2511_v27, %s2151_s28  ;;  %s1482_s28 = sshll.u32 %s566_s16, 4  ;;  %s2662_s28 = int_to_ptr.vmem [resolvable:$true] %s1482_s28 }
 0x18d   : > { %s2066_s27 = scalar_lea.vmem %s2662_s28, 512 }
 0x18e   : > { %p2067_p3 = scmp.ne.s32.totalorder %s2662_s28, %s2066_s27 }
 0x190   : > { %p2068_p5 = pnand %p2067_p3, %p2403_p10 }
 0x192   : > { %p2069_p7 = pneg %p2068_p5 }
 0x1fa   : > { %v676_v33 = vpop.permute.xlu0 %675 }
 0x1fb   : > { %1753 = vmatprep.subr.msk.bf16.mxu1 %vm679_vm1, %v676_v33  ;;  %v687_v34 = vsel %vm679_vm1, %v676_v33, 0 }
 0x1fc   : > { %1694 = vmatpush3.bf16.xpose.msra.mxu1 %v687_v34 }
 0x1fe   : > { %v678_v35 = vpop.permute.xlu0 %677 }
 0x1ff   : > { %1754 = vmatprep.subr.msk.bf16.mxu1 %vm679_vm1, %v678_v35  ;;  %v690_v36 = vsel %vm679_vm1, %v678_v35, 0 }
 0x204   : > { %1696 = vmatpush3.bf16.xpose.msra.mxu1 %v690_v36 }
 0x20b   : > { %1698 = vmatmul.mubr.msk.bf16.vlgmr.msra.gmra.mrb[0].mxu1 %vm679_vm1, %v2515_v31 }
 0x2de   : > { %v1699_v39 = vpop.f32.mrb[0].mxu1 }
 0x2df   : > { %v735_v40 = vadd.f32 %v1699_v39, %v2529_v37  ;;  %v726_v41 = vpop.f32.mrb[1].mxu1 }
 0x2e0   : > { %v727_v43 = vadd.f32 %v726_v41, %v2531_v38  ;;  %v1700_v44 = vpop.f32.mrb[2].mxu1 }
 0x2e1   : > { %v729_v45 = vpop.f32.mrb[3].mxu1  ;;  %v747_v46 = vsel %vm605_vm0, %v735_v40, -inf  ;;  %v738_v50 = vadd.f32 %v1700_v44, %v2540_v49 }
 0x2e2   : > { %v730_v47 = vadd.f32 %v729_v45, %v2534_v42  ;;  %748 = vmax.xlane.f32.xlu0 %v747_v46  ;;  %v741_v48 = vsel %vm605_vm0, %v727_v43, -inf }
 0x2e3   : > { %742 = vmax.xlane.f32.xlu1 %v741_v48  ;;  %v750_v52 = vsel %vm605_vm0, %v738_v50, -inf }
 0x2e4   : > { %v744_v51 = vsel %vm605_vm0, %v730_v47, -inf }
 0x2e7   : > { %745 = vmax.xlane.f32.xlu1 %v744_v51 }
 0x2eb   : > { %751 = vmax.xlane.f32.xlu1 %v750_v52 }
 0x2f8   : > { %789 = vrot.lane.b32.xlu0 %v2511_v27, %s2152_s23 }
 0x2fc   : > { %787 = vrot.lane.b32.xlu1 %v2513_v30, %s2152_s23 }
 0x36f   : > { %v749_v53 = vpop.xlane.xlu0 %748 }
 0x370   : > { %v755_v54 = vsub.f32 %v735_v40, %v749_v53  ;;  %v743_v55 = vpop.xlane.xlu1 %742 }
 0x371   : > { %v753_v56 = vsub.f32 %v727_v43, %v743_v55 }
 0x372   : > { %v761_v57 = vmul.f32 1.442695, %v755_v54 }
 0x373   : > { %v757_v58 = vmul.f32 1.442695, %v753_v56  ;;  %v790_v3 = vpop.permute.xlu0 %789 }
 0x374   : > { %1876 = vpow2.f32 %v761_v57  ;;  %v746_v59 = vpop.xlane.xlu1 %745 }
 0x375   : > { %1878 = vpow2.f32 %v757_v58  ;;  %v754_v60 = vsub.f32 %v730_v47, %v746_v59 }
 0x377   : > { %v759_v63 = vmul.f32 1.442695, %v754_v60 }
 0x378   : > { %v752_v61 = vpop.xlane.xlu1 %751 }
 0x379   : > { %v756_v62 = vsub.f32 %v738_v50, %v752_v61 }
 0x37b   : > { %v763_v0 = vmul.f32 1.442695, %v756_v62 }
 0x37c   : > { %v788_v1 = vpop.permute.xlu1 %787 }
 0x37d   : > { %1880 = vpow2.f32 %v763_v0  ;;  %1701 = vmatprep.subr.bf16.mxu0 %v788_v1 }
 0x37e   : > { %v1877_v2 = vpop.eup %1876  ;;  %1702 = vmatpush3.bf16.msra.mxu0 %v788_v1  ;;  %1882 = vpow2.f32 %v759_v63 }
 0x37f   : > { %1703 = vmatprep.subr.bf16.mxu0 %v790_v3  ;;  %v771_v4 = vsel %vm605_vm0, %v1877_v2, 0.0  ;;  %v1879_v5 = vpop.eup %1878 }
 0x380   : > { %772 = vadd.xlane.f32.xlu1 %v771_v4  ;;  %v765_v7 = vsel %vm605_vm0, %v1879_v5, 0.0 }
 0x382   : > { %1704 = vmatpush3.bf16.msra.mxu0 %v790_v3 }
 0x384   : > { %766 = vadd.xlane.f32.xlu1 %v765_v7 }
 0x387   : > { %v1881_v8 = vpop.eup %1880 }
 0x388   : > { %v774_v10 = vsel %vm605_vm0, %v1881_v8, 0.0  ;;  %v1883_v11 = vpop.eup %1882 }
 0x389   : > { %775 = vadd.xlane.f32.xlu1 %v774_v10  ;;  %v768_v14 = vsel %vm605_vm0, %v1883_v11, 0.0 }
 0x38d   : > { %769 = vadd.xlane.f32.xlu1 %v768_v14 }
 0x39e   : > { %854 = vrot.lane.b32.xlu1 %v2513_v30, %s2153_s9 }
 0x3a2   : > { %856 = vrot.lane.b32.xlu1 %v2511_v27, %s2153_s9  ;;  %s2760_s9 = sld [smem:[#allocation20_spill]] }
 0x3a6   : > { %850 = vrot.lane.b32.xlu1 %v2518_v32, %s2154_s24 }
 0x3aa   : > { %852 = vrot.lane.b32.xlu1 %v2515_v31, %s2154_s24  ;;  %s2762_s24 = sld [smem:[#allocation21_spill]] }
 0x40d   : > { %v773_v15 = vpop.xlane.xlu1 %772 }
 0x411   : > { %v767_v16 = vpop.xlane.xlu1 %766 }
 0x416   : > { %v776_v17 = vpop.xlane.xlu1 %775 }
 0x417   : > { %1884 = vrcp.f32 %v776_v17 }
 0x418   : > { %1886 = vrcp.f32 %v767_v16 }
 0x419   : > { %1888 = vrcp.f32 %v773_v15 }
 0x41a   : > { %v770_v18 = vpop.xlane.xlu1 %769 }
 0x41b   : > { %1890 = vrcp.f32 %v770_v18 }
 0x41e   : > { %v855_v19 = vpop.permute.xlu1 %854 }
 0x41f   : > { %1755 = vmatprep.subr.msk.bf16.mxu0 %vm679_vm1, %v855_v19  ;;  %v865_v33 = vsel %vm679_vm1, %v855_v19, 0 }
 0x421   : > { %v1885_v20 = vpop.eup %1884 }
 0x422   : > { %v1887_v21 = vpop.eup %1886  ;;  %v784_v24 = vmul.f32 %v1885_v20, %v1881_v8  ;;  %v857_v25 = vpop.permute.xlu1 %856 }
 0x423   : > { %v1889_v22 = vpop.eup %1888  ;;  %v781_v26 = vmul.f32 %v1887_v21, %v1879_v5  ;;  %v868_v35 = vsel %vm679_vm1, %v857_v25, 0 }
 0x424   : > { %v783_v29 = vmul.f32 %v1889_v22, %v1877_v2 }
 0x425   : > { %v1891_v23 = vpop.eup %1890 }
 0x426   : > { %v782_v28 = vmul.f32 %v1891_v23, %v1883_v11  ;;  %v786_v32 = vpack.c.bf16 %v784_v24, %v783_v29  ;;  %v851_v34 = vpop.permute.xlu1 %850  ;;  %v1869_v29 = vld [vmem:[#allocation7 + $0x8] sm:$0xff]  }
 0x428   : > { %v785_v31 = vpack.c.bf16 %v782_v28, %v781_v26  ;;  %v1868_v28 = vld [vmem:[#allocation7] sm:$0xff]  }
 0x42a   : > { %1705 = vmatprep.mubr.msk.bf16.mxu0 %vm605_vm0, %v785_v31  ;;  %v853_v36 = vpop.permute.xlu1 %852 }
 0x42b   : > { %1706 = vmatmul.mubr.msk.bf16.vlgmr.msra.gmra.mrb[4].mxu0 %vm605_vm0, %v786_v32 }
 0x42c   : > { %1710 = vmatpush3.bf16.xpose.msra.mxu0 %v865_v33  ;;  %1713 = vmatprep.mubr.msk.bf16.mxu0 %vm679_vm1, %v851_v34 }
 0x42d   : > { %1756 = vmatprep.subr.msk.bf16.mxu0 %vm679_vm1, %v857_v25 }
 0x434   : > { %1712 = vmatpush3.bf16.xpose.msra.mxu0 %v868_v35 }
 0x43b   : > { %1714 = vmatmul.mubr.msk.bf16.vlgmr.msra.gmra.mrb[8].mxu0 %vm679_vm1, %v853_v36 }
 0x4fe   : > { %v2563_v39 = vpop.f32.mrb[4].mxu0 }
 0x4ff   : > { %v2565_v40 = vpop.f32.mrb[5].mxu0 }
 0x500   : > { %v2567_v41 = vpop.f32.mrb[6].mxu0 }
 0x501   : > { %v2569_v43 = vpop.f32.mrb[7].mxu0 }
 0x50e   : > { %v1715_v44 = vpop.f32.mrb[8].mxu0 }
 0x50f   : > { %v904_v45 = vpop.f32.mrb[9].mxu0  ;;  %v913_v50 = vadd.f32 %v1715_v44, %v2529_v37 }
 0x510   : > { %v905_v46 = vadd.f32 %v904_v45, %v2531_v38  ;;  %v1716_v47 = vpop.f32.mrb[10].mxu0 }
 0x511   : > { %v907_v48 = vpop.f32.mrb[11].mxu0  ;;  %v916_v54 = vadd.f32 %v1716_v47, %v2540_v49  ;;  %v925_v55 = vsel %vm605_vm0, %v913_v50, -inf }
 0x512   : > { %v908_v51 = vadd.f32 %v907_v48, %v2534_v42  ;;  %v919_v52 = vsel %vm605_vm0, %v905_v46, -inf }
 0x513   : > { %920 = vmax.xlane.f32.xlu0 %v919_v52  ;;  %v928_v56 = vsel %vm605_vm0, %v916_v54, -inf }
 0x514   : > { %v922_v53 = vsel %vm605_vm0, %v908_v51, -inf }
 0x515   : > { %923 = vmax.xlane.f32.xlu1 %v922_v53 }
 0x517   : > { %926 = vmax.xlane.f32.xlu0 %v925_v55 }
 0x51b   : > { %929 = vmax.xlane.f32.xlu0 %v928_v56 }
 0x5a0   : > { %v921_v38 = vpop.xlane.xlu0 %920 }
 0x5a1   : > { %v931_v57 = vsub.f32 %v905_v46, %v921_v38 }
 0x5a2   : > { %v924_v58 = vpop.xlane.xlu1 %923 }
 0x5a3   : > { %v935_v42 = vmul.f32 1.442695, %v931_v57  ;;  %v932_v60 = vsub.f32 %v908_v51, %v924_v58 }
 0x5a4   : > { %v927_v37 = vpop.xlane.xlu0 %926 }
 0x5a5   : > { %v933_v59 = vsub.f32 %v913_v50, %v927_v37  ;;  %v937_v0 = vmul.f32 1.442695, %v932_v60 }
 0x5a7   : > { %v939_v61 = vmul.f32 1.442695, %v933_v59 }
 0x5a8   : > { %v930_v62 = vpop.xlane.xlu0 %929 }
 0x5a9   : > { %1892 = vpow2.f32 %v939_v61  ;;  %v934_v63 = vsub.f32 %v916_v54, %v930_v62 }
 0x5aa   : > { %1894 = vpow2.f32 %v935_v42 }
 0x5ab   : > { %v941_v49 = vmul.f32 1.442695, %v934_v63 }
 0x5ad   : > { %1896 = vpow2.f32 %v941_v49 }
 0x5ae   : > { %1898 = vpow2.f32 %v937_v0 }
 0x5b3   : > { %v1893_v1 = vpop.eup %1892 }
 0x5b4   : > { %v949_v2 = vsel %vm605_vm0, %v1893_v1, 0.0  ;;  %v1895_v3 = vpop.eup %1894 }
 0x5b5   : > { %950 = vadd.xlane.f32.xlu1 %v949_v2  ;;  %v943_v5 = vsel %vm605_vm0, %v1895_v3, 0.0 }
 0x5b7   : > { %v1897_v4 = vpop.eup %1896 }
 0x5b8   : > { %v952_v7 = vsel %vm605_vm0, %v1897_v4, 0.0  ;;  %v1899_v8 = vpop.eup %1898 }
 0x5b9   : > { %944 = vadd.xlane.f32.xlu1 %v943_v5  ;;  %953 = vadd.xlane.f32.xlu0 %v952_v7  ;;  %v946_v10 = vsel %vm605_vm0, %v1899_v8, 0.0 }
 0x5bd   : > { %947 = vadd.xlane.f32.xlu0 %v946_v10 }
 0x5ca   : > { %965 = vrot.lane.b32.xlu1 %v2513_v30, %s2155_s25 }
 0x5d3   : > { %967 = vrot.lane.b32.xlu0 %v2511_v27, %s2155_s25  ;;  %s2765_s25 = sld [smem:[#allocation24_spill]] }
 0x642   : > { %v951_v11 = vpop.xlane.xlu1 %950 }
 0x646   : > { %v945_v14 = vpop.xlane.xlu1 %944  ;;  %v954_v15 = vpop.xlane.xlu0 %953 }
 0x647   : > { %1900 = vrcp.f32 %v954_v15 }
 0x648   : > { %1902 = vrcp.f32 %v945_v14 }
 0x649   : > { %1904 = vrcp.f32 %v951_v11 }
 0x64a   : > { %v966_v16 = vpop.permute.xlu1 %965  ;;  %v948_v17 = vpop.xlane.xlu0 %947 }
 0x64b   : > { %1906 = vrcp.f32 %v948_v17  ;;  %1717 = vmatprep.subr.bf16.mxu1 %v966_v16 }
 0x64c   : > { %1718 = vmatpush3.bf16.msra.mxu1 %v966_v16 }
 0x64e   : > { %v968_v18 = vpop.permute.xlu0 %967 }
 0x64f   : > { %1719 = vmatprep.subr.bf16.mxu1 %v968_v18 }
 0x650   : > { %1720 = vmatpush3.bf16.msra.mxu1 %v968_v18 }
 0x651   : > { %v1901_v19 = vpop.eup %1900  ;;  %1725 = vmatprep.subr.bf16.mxu1 %v1868_v28 }
 0x652   : > { %v1903_v20 = vpop.eup %1902  ;;  %v962_v22 = vmul.f32 %v1901_v19, %v1897_v4 }
 0x653   : > { %v1905_v21 = vpop.eup %1904  ;;  %v959_v27 = vmul.f32 %v1903_v20, %v1895_v3 }
 0x654   : > { %v961_v24 = vmul.f32 %v1905_v21, %v1893_v1 }
 0x655   : > { %v1907_v30 = vpop.eup %1906 }
 0x656   : > { %v960_v23 = vmul.f32 %v1907_v30, %v1899_v8  ;;  %v964_v26 = vpack.c.bf16 %v962_v22, %v961_v24  ;;  %v1870_v30 = vld [vmem:[%s2759_s17] sm:$0xff]   ;;  %v1871_v22 = vld [vmem:[%s2759_s17 + $0x8] sm:$0xff]  }
 0x657   : > { %1733 = vmatprep.subr.bf16.mxu0 %v1870_v30 }
 0x658   : > { %v963_v25 = vpack.c.bf16 %v960_v23, %v959_v27  ;;  %1734 = vmatpush3.bf16.msra.mxu0 %v1870_v30  ;;  %v1872_v27 = vld [vmem:[%s2760_s9] sm:$0xff]   ;;  %v1873_v23 = vld [vmem:[%s2760_s9 + $0x8] sm:$0xff]  }
 0x659   : > { %1735 = vmatprep.subr.bf16.mxu0 %v1871_v22 }
 0x65a   : > { %1721 = vmatprep.mubr.msk.bf16.mxu1 %vm605_vm0, %v963_v25 }
 0x65b   : > { %1722 = vmatmul.mubr.msk.bf16.vlgmr.msra.gmra.mrb[4].mxu1 %vm605_vm0, %v964_v26 }
 0x65c   : > { %1726 = vmatpush3.bf16.msra.mxu1 %v1868_v28  ;;  %1736 = vmatpush3.bf16.msra.mxu0 %v1871_v22 }
 0x65d   : > { %1727 = vmatprep.subr.bf16.mxu1 %v1869_v29 }
 0x660   : > { %1728 = vmatpush3.bf16.msra.mxu1 %v1869_v29 }
 0x661   : > { %1741 = vmatprep.subr.bf16.mxu1 %v1872_v27 }
 0x72e   : > { %v1723_v31 = vpop.f32.mrb[4].mxu1 }
 0x72f   : > { %v1011_v32 = vpop.f32.mrb[5].mxu1 }
 0x730   : > { %v1724_v33 = vpop.f32.mrb[6].mxu1 }
 0x731   : > { %v1861_v34 = vpack.i.bf16 %v1724_v33, %v1723_v31  ;;  %v1014_v35 = vpop.f32.mrb[7].mxu1 }
 0x732   : > { %v1856_v36 = vpack.i.bf16 %v1014_v35, %v1011_v32 }
 0x734   : > { %1857 = vrot.lane.b32.xlu1 %v1856_v36, %s2156_s14 }
 0x738   : > { %1862 = vrot.lane.b32.xlu1 %v1861_v34, %s2156_s14 }
 0x7a6   : > { %v1858_v44 = vpop.permute.xlu1 %1857 }
 0x7a7   : > { %v1860_v45 = vunpack.i.h.bf16 %v1858_v44  ;;  %v1859_v46 = vunpack.i.l.bf16 %v1858_v44 }
 0x7a9   : > { %v1043_v47 = vsel %vm679_vm1, %v2569_v43, %v1860_v45  ;;  %v1042_v48 = vsel %vm679_vm1, %v2565_v40, %v1859_v46  ;;  %v1623_v43 = vld [vmem:[%s2714_s6] ss:$0 sm:$0xff]  ;;  %v1628_v46 = vld [vmem:[#allocation8] ss:$0 sm:$0xff] }
 0x7aa   : > { %v1046_v50 = vpack.c.bf16 %v1043_v47, %v1042_v48  ;;  %v1863_v51 = vpop.permute.xlu1 %1862 }
 0x7ab   : > { %v1865_v52 = vunpack.i.h.bf16 %v1863_v51  ;;  %v1864_v53 = vunpack.i.l.bf16 %v1863_v51 }
 0x7ac   : > { %1729 = vmatprep.mubr.msk.bf16.mxu1 %vm605_vm0, %v1046_v50 }
 0x7ad   : > { %v1045_v54 = vsel %vm679_vm1, %v2567_v41, %v1865_v52  ;;  %v1044_v55 = vsel %vm679_vm1, %v2563_v39, %v1864_v53  ;;  %v1629_v53 = vld [vmem:[#allocation10] ss:$0 sm:$0xff] }
 0x7ae   : > { %v1047_v56 = vpack.c.bf16 %v1045_v54, %v1044_v55 }
 0x7b0   : > { %1730 = vmatmul.mubr.msk.bf16.vlgmr.msra.gmra.mrb[8].mxu1 %vm605_vm0, %v1047_v56 }
 0x7b1   : > { %1742 = vmatpush3.bf16.msra.mxu1 %v1872_v27 }
 0x7b2   : > { %1743 = vmatprep.subr.bf16.mxu1 %v1873_v23 }
 0x7b5   : > { %1744 = vmatpush3.bf16.msra.mxu1 %v1873_v23 }
 0x883   : > { %v1731_v40 = vpop.f32.mrb[8].mxu1 }
 0x884   : > { %v1111_v38 = vpop.f32.mrb[9].mxu1  ;;  %v1120_v57 = vadd.f32 %v1731_v40, %v1623_v43 }
 0x885   : > { %v1112_v58 = vadd.f32 %v1623_v43, %v1111_v38  ;;  %v1732_v37 = vpop.f32.mrb[10].mxu1 }
 0x886   : > { %v1114_v59 = vpop.f32.mrb[11].mxu1  ;;  %v1123_v41 = vadd.f32 %v1732_v37, %v1623_v43  ;;  %v1128_v62 = vadd.f32 %v1120_v57, %v2498_v12 }
 0x887   : > { %v1115_v42 = vadd.f32 %v1623_v43, %v1114_v59  ;;  %v1126_v60 = vadd.f32 %v1112_v58, %v2488_v6 }
 0x888   : > { %v1136_v0 = vsel %vm605_vm0, %v1128_v62, 0.0  ;;  %v1129_v49 = vadd.f32 %v1123_v41, %v2500_v13  ;;  %v1874_v41 = vld [vmem:[%s2760_s9 + $0x10] sm:$0xff]  }
 0x889   : > { %v1130_v61 = vsel %vm605_vm0, %v1126_v60, 0.0  ;;  %v1127_v39 = vadd.f32 %v1115_v42, %v2490_v9  ;;  %1745 = vmatprep.subr.bf16.mxu1 %v1874_v41 }
 0x88a   : > { %1131 = vadd.xlane.f32.xlu0 %v1130_v61  ;;  %v1139_v1 = vsel %vm605_vm0, %v1129_v49, 0.0  ;;  %1746 = vmatpush3.bf16.msra.mxu1 %v1874_v41  ;;  %v1875_v61 = vld [vmem:[%s2760_s9 + $0x18] sm:$0xff]  }
 0x88b   : > { %v1133_v63 = vsel %vm605_vm0, %v1127_v39, 0.0  ;;  %1747 = vmatprep.subr.bf16.mxu1 %v1875_v61 }
 0x88c   : > { %1134 = vadd.xlane.f32.xlu1 %v1133_v63 }
 0x88e   : > { %1137 = vadd.xlane.f32.xlu0 %v1136_v0  ;;  %1748 = vmatpush3.bf16.msra.mxu1 %v1875_v61 }
 0x892   : > { %1140 = vadd.xlane.f32.xlu0 %v1139_v1 }
 0x917   : > { %v1132_v6 = vpop.xlane.xlu0 %1131 }
 0x918   : > { %v1143_v2 = vmul.f32 0.03125, %v1132_v6 }
 0x919   : > { %v1135_v3 = vpop.xlane.xlu1 %1134 }
 0x91a   : > { %v1147_v4 = vsub.f32 %v1126_v60, %v1143_v2  ;;  %v1144_v5 = vmul.f32 0.03125, %v1135_v3 }
 0x91b   : > { %v1138_v9 = vpop.xlane.xlu0 %1137 }
 0x91c   : > { %v1148_v7 = vsub.f32 %v1127_v39, %v1144_v5  ;;  %v1145_v12 = vmul.f32 0.03125, %v1138_v9  ;;  %v1151_v8 = vmul.f32 %v1147_v4, %v1147_v4  ;;  %v1630_v39 = vld [vmem:[%s2761_s26] ss:$0 sm:$0xff]  ;;  %s1650_s26 = sshll.u32 %s2261_s22, 9  ;;  %s1469_s22 = scalar_lea.sflag [#allocation4], %s2458_s30 }
 0x91d   : > { %s2660_s14 = scalar_lea.hbm %s2765_s25, %s1650_s26 }
 0x91e   : > { %v1149_v10 = vsub.f32 %v1128_v62, %v1145_v12  ;;  %v1155_v11 = vsel %vm605_vm0, %v1151_v8, 0.0  ;;  %v1152_v14 = vmul.f32 %v1148_v7, %v1148_v7 }
 0x91f   : > { %1156 = vadd.xlane.f32.xlu1 %v1155_v11  ;;  %v1141_v15 = vpop.xlane.xlu0 %1140 }
 0x920   : > { %v1146_v13 = vmul.f32 0.03125, %v1141_v15  ;;  %v1158_v16 = vsel %vm605_vm0, %v1152_v14, 0.0  ;;  %v1153_v17 = vmul.f32 %v1149_v10, %v1149_v10 }
 0x921   : > { %1159 = vadd.xlane.f32.xlu0 %v1158_v16 }
 0x922   : > { %v1150_v18 = vsub.f32 %v1129_v49, %v1146_v13  ;;  %v1161_v19 = vsel %vm605_vm0, %v1153_v17, 0.0 }
 0x923   : > { %1162 = vadd.xlane.f32.xlu1 %v1161_v19 }
 0x924   : > { %v1154_v20 = vmul.f32 %v1150_v18, %v1150_v18 }
 0x926   : > { %v1164_v21 = vsel %vm605_vm0, %v1154_v20, 0.0 }
 0x927   : > { %1165 = vadd.xlane.f32.xlu0 %v1164_v21 }
 0x9ac   : > { %v1157_v24 = vpop.xlane.xlu1 %1156 }
 0x9ad   : > { %v1167_v25 = vmul.f32 0.03125, %v1157_v24 }
 0x9ae   : > { %v1160_v26 = vpop.xlane.xlu0 %1159 }
 0x9af   : > { %v1171_v28 = vadd.f32 1e-05, %v1167_v25  ;;  %v1168_v29 = vmul.f32 0.03125, %v1160_v26 }
 0x9b0   : > { %v1163_v31 = vpop.xlane.xlu1 %1162 }
 0x9b1   : > { %1908 = vrsqrt.f32 %v1171_v28  ;;  %v1172_v32 = vadd.f32 1e-05, %v1168_v29  ;;  %v1169_v33 = vmul.f32 0.03125, %v1163_v31 }
 0x9b3   : > { %1910 = vrsqrt.f32 %v1172_v32  ;;  %v1173_v34 = vadd.f32 1e-05, %v1169_v33 }
 0x9b4   : > { %v1166_v35 = vpop.xlane.xlu0 %1165 }
 0x9b5   : > { %1912 = vrsqrt.f32 %v1173_v34  ;;  %v1170_v36 = vmul.f32 0.03125, %v1166_v35 }
 0x9b7   : > { %v1174_v44 = vadd.f32 1e-05, %v1170_v36 }
 0x9b9   : > { %1914 = vrsqrt.f32 %v1174_v44 }
 0x9bb   : > { %v1909_v45 = vpop.eup %1908 }
 0x9bc   : > { %v1179_v47 = vmul.f32 %v1909_v45, %v1147_v4 }
 0x9bd   : > { %v1911_v48 = vpop.eup %1910 }
 0x9be   : > { %v1180_v50 = vmul.f32 %v1911_v48, %v1148_v7  ;;  %v1190_v51 = vmul.f32 %v1628_v46, %v1179_v47 }
 0x9bf   : > { %v1913_v52 = vpop.eup %1912 }
 0x9c0   : > { %v1181_v54 = vmul.f32 %v1913_v52, %v1149_v10  ;;  %v1191_v55 = vmul.f32 %v1628_v46, %v1180_v50  ;;  %v1201_v56 = vadd.f32 %v1629_v53, %v1190_v51  ;;  %v1635_v10 = vld [vmem:[%s2762_s24] ss:$0 sm:$0xff] }
 0x9c2   : > { %v1202_v43 = vadd.f32 %v1629_v53, %v1191_v55  ;;  %v1192_v38 = vmul.f32 %v1628_v46, %v1181_v54 }
 0x9c3   : > { %v1915_v40 = vpop.eup %1914 }
 0x9c4   : > { %v1182_v57 = vmul.f32 %v1915_v40, %v1150_v18  ;;  %v1205_v58 = vpack.c.bf16 %v1202_v43, %v1201_v56  ;;  %v1203_v59 = vadd.f32 %v1629_v53, %v1192_v38 }
 0x9c6   : > { %v1193_v37 = vmul.f32 %v1628_v46, %v1182_v57  ;;  %1737 = vmatprep.mubr.msk.bf16.mxu0 %vm605_vm0, %v1205_v58 }
 0x9c8   : > { %v1204_v42 = vadd.f32 %v1629_v53, %v1193_v37 }
 0x9ca   : > { %v1206_v60 = vpack.c.bf16 %v1204_v42, %v1203_v59 }
 0x9cc   : > { %1738 = vmatmul.mubr.msk.bf16.vlgmr.msra.gmra.mrb[12].mxu0 %vm605_vm0, %v1206_v60 }
 0xa9f   : > { %v1739_v62 = vpop.f32.mrb[12].mxu0 }
 0xaa0   : > { %v1279_v63 = vadd.f32 %v1739_v62, %v1630_v39  ;;  %v1270_v0 = vpop.f32.mrb[13].mxu0  ;;  %v1642_v62 = vld [vmem:[%s2763_s10] ss:$0 sm:$0xff]  ;;  %s2157_s10 = smov [#allocation11]  }
 0xaa1   : > { %v1271_v49 = vadd.f32 %v1630_v39, %v1270_v0  ;;  %v1740_v1 = vpop.f32.mrb[14].mxu0  ;;  %s2070_s15 = sshll.u32 %s2157_s10, 4  ;;  %s2071_s15 = int_to_ptr.vmem [resolvable:$false] %s2070_s15 }
 0xaa2   : > { %v1282_v6 = vadd.f32 %v1740_v1, %v1630_v39  ;;  %v1273_v2 = vpop.f32.mrb[15].mxu0  ;;  %v1287_v4 = vmax.f32 %v1279_v63, 0.0  ;;  %s2072_s11 = scalar_lea.vmem %s2071_s15, 1024  ;;  %p2073_p12 = scmp.lt.s32.totalorder %s2662_s28, %s2071_s15 }
 0xaa3   : > { %v1274_v3 = vadd.f32 %v1630_v39, %v1273_v2  ;;  %v1285_v9 = vmax.f32 %v1271_v49, 0.0  ;;  %v1643_v49 = vld [vmem:[%s2764_s29] ss:$0 sm:$0xff]  ;;  %p2074_p1 = scmp.lt.s32.totalorder %s2072_s11, %s2066_s27 }
 0xaa4   : > { %v1288_v5 = vmax.f32 %v1282_v6, 0.0 }
 0xaa5   : > { %v1286_v7 = vmax.f32 %v1274_v3, 0.0  ;;  %p2075_p2 = por %p2074_p1, %p2073_p12 }
 0xaa6   : > { %v1290_v12 = vpack.c.bf16 %v1288_v5, %v1287_v4 }
 0xaa7   : > { %v1289_v8 = vpack.c.bf16 %v1286_v7, %v1285_v9  ;;  %p2076_p13 = pnand %p2075_p2, %p2069_p7 }
 0xaa9   : > { %1749 = vmatprep.mubr.msk.bf16.mxu1 %vm1330_vm2, %v1289_v8 }
 0xaaa   : > { %1750 = vmatmul.mubr.msk.bf16.vlgmr.msra.gmra.mrb[12].mxu1 %vm1330_vm2, %v1290_v12 }
 0xb7d   : > { %v1751_v11 = vpop.f32.mrb[12].mxu1 }
 0xb7e   : > { %v1371_v14 = vpop.f32.mrb[13].mxu1  ;;  %v1380_v15 = vadd.f32 %v1751_v11, %v1635_v10 }
 0xb7f   : > { %v1372_v13 = vadd.f32 %v1635_v10, %v1371_v14  ;;  %v1752_v16 = vpop.f32.mrb[14].mxu1 }
 0xb80   : > { %v1374_v17 = vpop.f32.mrb[15].mxu1  ;;  %v1383_v18 = vadd.f32 %v1752_v16, %v1635_v10  ;;  %v1388_v22 = vadd.f32 %v1380_v15, %v1203_v59 }
 0xb81   : > { %v1375_v19 = vadd.f32 %v1635_v10, %v1374_v17  ;;  %v1386_v20 = vadd.f32 %v1372_v13, %v1201_v56 }
 0xb82   : > { %v1389_v23 = vadd.f32 %v1383_v18, %v1204_v42  ;;  %v1396_v24 = vsel %vm605_vm0, %v1388_v22, 0.0 }
 0xb83   : > { %v1390_v21 = vsel %vm605_vm0, %v1386_v20, 0.0  ;;  %v1387_v30 = vadd.f32 %v1375_v19, %v1202_v43 }
 0xb84   : > { %1391 = vadd.xlane.f32.xlu1 %v1390_v21  ;;  %v1399_v25 = vsel %vm605_vm0, %v1389_v23, 0.0 }
 0xb85   : > { %v1393_v27 = vsel %vm605_vm0, %v1387_v30, 0.0 }
 0xb86   : > { %1394 = vadd.xlane.f32.xlu0 %v1393_v27 }
 0xb88   : > { %1397 = vadd.xlane.f32.xlu1 %v1396_v24 }
 0xb8a   : > { %1400 = vadd.xlane.f32.xlu0 %v1399_v25 }
 0xc11   : > { %v1392_v26 = vpop.xlane.xlu1 %1391 }
 0xc12   : > { %v1402_v28 = vmul.f32 0.03125, %v1392_v26 }
 0xc13   : > { %v1395_v29 = vpop.xlane.xlu0 %1394 }
 0xc14   : > { %v1406_v31 = vsub.f32 %v1386_v20, %v1402_v28  ;;  %v1403_v32 = vmul.f32 0.03125, %v1395_v29 }
 0xc15   : > { %v1398_v33 = vpop.xlane.xlu1 %1397 }
 0xc16   : > { %v1407_v34 = vsub.f32 %v1387_v30, %v1403_v32  ;;  %v1404_v35 = vmul.f32 0.03125, %v1398_v33  ;;  %v1410_v36 = vmul.f32 %v1406_v31, %v1406_v31 }
 0xc17   : > { %v1401_v44 = vpop.xlane.xlu0 %1400 }
 0xc18   : > { %v1408_v45 = vsub.f32 %v1388_v22, %v1404_v35  ;;  %v1405_v46 = vmul.f32 0.03125, %v1401_v44  ;;  %v1414_v47 = vsel %vm605_vm0, %v1410_v36, 0.0  ;;  %v1411_v48 = vmul.f32 %v1407_v34, %v1407_v34 }
 0xc19   : > { %1415 = vadd.xlane.f32.xlu1 %v1414_v47 }
 0xc1a   : > { %v1409_v50 = vsub.f32 %v1389_v23, %v1405_v46  ;;  %v1417_v51 = vsel %vm605_vm0, %v1411_v48, 0.0  ;;  %v1412_v52 = vmul.f32 %v1408_v45, %v1408_v45 }
 0xc1b   : > { %1418 = vadd.xlane.f32.xlu0 %v1417_v51 }
 0xc1c   : > { %v1420_v53 = vsel %vm605_vm0, %v1412_v52, 0.0  ;;  %v1413_v54 = vmul.f32 %v1409_v50, %v1409_v50 }
 0xc1d   : > { %1421 = vadd.xlane.f32.xlu1 %v1420_v53 }
 0xc1e   : > { %v1423_v55 = vsel %vm605_vm0, %v1413_v54, 0.0 }
 0xc1f   : > { %1424 = vadd.xlane.f32.xlu0 %v1423_v55 }
 0xca6   : > { %v1416_v56 = vpop.xlane.xlu1 %1415 }
 0xca7   : > { %v1426_v43 = vmul.f32 0.03125, %v1416_v56 }
 0xca8   : > { %v1419_v40 = vpop.xlane.xlu0 %1418 }
 0xca9   : > { %v1430_v38 = vadd.f32 1e-05, %v1426_v43  ;;  %v1427_v57 = vmul.f32 0.03125, %v1419_v40 }
 0xcaa   : > { %v1422_v58 = vpop.xlane.xlu1 %1421 }
 0xcab   : > { %1916 = vrsqrt.f32 %v1430_v38  ;;  %v1431_v37 = vadd.f32 1e-05, %v1427_v57  ;;  %v1428_v59 = vmul.f32 0.03125, %v1422_v58 }
 0xcac   : > { %v1425_v42 = vpop.xlane.xlu0 %1424 }
 0xcad   : > { %1918 = vrsqrt.f32 %v1431_v37  ;;  %v1432_v60 = vadd.f32 1e-05, %v1428_v59  ;;  %v1429_v41 = vmul.f32 0.03125, %v1425_v42 }
 0xcaf   : > { %1920 = vrsqrt.f32 %v1432_v60  ;;  %v1433_v61 = vadd.f32 1e-05, %v1429_v41 }
 0xcb1   : > { %1922 = vrsqrt.f32 %v1433_v61 }
 0xcb5   : > { %v1917_v39 = vpop.eup %1916 }
 0xcb6   : > { %v1438_v63 = vmul.f32 %v1917_v39, %v1406_v31 }
 0xcb7   : > { %v1919_v0 = vpop.eup %1918 }
 0xcb8   : > { %v1449_v1 = vmul.f32 %v1642_v62, %v1438_v63  ;;  %v1439_v6 = vmul.f32 %v1919_v0, %v1407_v34 }
 0xcb9   : > { %v1921_v2 = vpop.eup %1920 }
 0xcba   : > { %v1460_v3 = vadd.f32 %v1643_v49, %v1449_v1  ;;  %v1450_v4 = vmul.f32 %v1642_v62, %v1439_v6  ;;  %v1440_v5 = vmul.f32 %v1921_v2, %v1408_v45 }
 0xcbb   : > { %v1923_v9 = vpop.eup %1922 }
 0xcbc   : > { %v1461_v7 = vadd.f32 %v1643_v49, %v1450_v4  ;;  %v1451_v12 = vmul.f32 %v1642_v62, %v1440_v5  ;;  %1464 = vst.msk [vmem:[%s566_s16] sm:$0xff] %vm605_vm0, %v1460_v3  ;;  %v1441_v8 = vmul.f32 %v1923_v9, %v1409_v50 }
 0xcbe   : > { %v1462_v10 = vadd.f32 %v1643_v49, %v1451_v12  ;;  %1465 = vst.msk [vmem:[%s566_s16 + $0x8] sm:$0xff] %vm605_vm0, %v1461_v7  ;;  %v1452_v11 = vmul.f32 %v1642_v62, %v1441_v8 }
 0xcc0   : > { %1466 = vst.msk [vmem:[%s566_s16 + $0x10] sm:$0xff] %vm605_vm0, %v1462_v10  ;;  %v1463_v14 = vadd.f32 %v1643_v49, %v1452_v11 }
 0xcc2   : > { %1467 = vst.msk [vmem:[%s566_s16 + $0x18] sm:$0xff] %vm605_vm0, %v1463_v14 }
 0xcc3   : > { %2079 = shalt.err (!%p2076_p13)
}
 0xcc4   : > { %s2080_s29 = scalar_lea.hbm %s2660_s14, 512  ;;  %s2084_s23 = scalar_lea.hbm %s2765_s25, 1024 }
 0xcc5   : > { %p2081_p9 = scmp.ne.s32.totalorder %s2660_s14, %s2080_s29  ;;  %p2085_p4 = scmp.lt.u32.totalorder %s2660_s14, %s2765_s25 }
 0xcc6   : > { %p2086_p8 = scmp.lt.u32.totalorder %s2084_s23, %s2080_s29  ;;  %p2088_p3 = scmp.lt.u32.totalorder %s2080_s29, %s2660_s14 }
 0xcc7   : > { %p2082_p0 = pnand %p2081_p9, %p2403_p10 }
 0xcc8   : > { %p2087_p6 = por %p2086_p8, %p2085_p4 }
 0xcc9   : > { %p2083_p11 = pneg %p2082_p0 }
 0xcca   : > { %p2089_p5 = por %p2088_p3, %p2087_p6 }
 0xccc   : > { %p2090_p7 = pnand %p2089_p5, %p2083_p11 }
 0xcce   : > { %2093 = shalt.err (!%p2090_p7)
}
 0xccf   : > { %s2158_s27 = smov 128   ;;  %s2159_s15 = smov 8  }
 0xcd0   : > { %1775 = dma.vmem_to_hbm [thread:$0]  (%p2403_p10), %s2662_s28, 512, %s2660_s14, %s1469_s22, %s2158_s27, %s2158_s27, %s2159_s15  }
 0xcd1 PF: > { %s2766_s11 = sld [smem:[#allocation16_spill]]  ;;  %s2767_s16 = sld [smem:[#allocation17_spill]] }
 0xcd2   : > { %p2769_p1 = scmp.ge.s32.totalorder %s2140_s21, 2 }
 0xcd7   : > { %s1497_s26 = sand.u32 1, %s2766_s11   ;;  %p2768_p12 = scmp.ne.s32.totalorder %s2767_s16, 0 }
 0xcd8   : > { %s1498_s29 = scalar_lea.sflag [#allocation4], %s1497_s26 }
 0xcd9   : > { %p1795_p2 = pnand %p2769_p1, %p2768_p12 }
 0xcdb   : > { %2123 = dma.done.wait (!%p1795_p2), %s1498_s29, 512  }
 0xcdc   : > { %2125 = vsyncadd (!%p1795_p2), %s1498_s29, 4294966784  ;;  %p30_p13 = scmp.ge.s32.totalorder %s2393_s13, 4   ;;  %s2770_s18 = smov %s2132_s19 }
 0xcdd   : > { %s2771_s19 = smov %s2136_s20  ;;  %s2772_s20 = smov %s2409_s12 }
 0xcde   : > { %s2773_s21 = smov %s2393_s13  ;;  %32 = sbr.rel (!%p30_p13) target bundleno = 15 (0xf), region = 141 }
 0xce5   :  { %1503 = vsyncpa [#allocation3], 1 }
 0xce6   :  { %1505 = vsyncpa [#allocation3 + $0x1], 1 }
 0xce7   :  { %1506 = vsyncpa [#allocation6], 1 }
 0xce8   :  { %1507 = vsyncpa [#allocation9], 1 }
 0xce9   :  { %1508 = vsyncpa [#allocation4], 1 }
 0xcea   :  { %1510 = vsyncpa [#allocation4 + $0x1], 1 }

</bundles_post_ra>
